<compile_context>
chip_gen: v7x
topology: tpu7x:2x2x1
jax: 0.10.0
libtpu: 0.0.40
codegen_flags: <defaults>
</compile_context>

<pallas_src>
import jax
import jax.numpy as jnp
from jax.experimental import pallas as pl
from jax.experimental.pallas import tpu as pltpu  # noqa: F401  (TPU backend)


# ---------------------------------------------------------------------------
# Fused Pallas kernel
# ---------------------------------------------------------------------------
def _gcn_bn_block(a_bf, h_f32, w_ref, b_ref, g_ref, beta_ref):
    """One GCN layer: BN(relu(A_hat @ X @ W + b)).  bf16 MXU, f32 tail."""
    d_in, d_out = w_ref.shape
    h_bf = h_f32.astype(jnp.bfloat16)
    w_bf = w_ref[...].astype(jnp.bfloat16)
    if d_in < d_out:
        # (A @ X) @ W   -- cheaper when the layer widens the features.
        ax = jnp.dot(a_bf, h_bf, preferred_element_type=jnp.float32)
        h = jnp.dot(ax.astype(jnp.bfloat16), w_bf,
                    preferred_element_type=jnp.float32)
    else:
        # A @ (X @ W)   -- cheaper when the layer narrows the features.
        xw = jnp.dot(h_bf, w_bf, preferred_element_type=jnp.float32)
        h = jnp.dot(a_bf, xw.astype(jnp.bfloat16),
                    preferred_element_type=jnp.float32)
    # bias + ReLU (f32, VPU)
    h = jnp.maximum(h + b_ref[...], 0.0)
    # BatchNorm1d, training-mode batch stats, affine folded into scale/shift.
    mean = jnp.mean(h, axis=0, keepdims=True)
    cent = h - mean
    var = jnp.mean(cent * cent, axis=0, keepdims=True)       # biased variance
    scale = g_ref[...] * jax.lax.rsqrt(var + 1e-5)            # EUP rsqrt
    shift = beta_ref[...] - mean * scale
    return h * scale + shift
    # TODO(synk): Dropout(0.5) between layers is stochastic; eval-mode identity.


def _fused_gnn_kernel(
    a_ref, x_ref,
    w1_ref, b1_ref, g1_ref, be1_ref,
    w2_ref, b2_ref, g2_ref, be2_ref,
    w3_ref, b3_ref, g3_ref, be3_ref,
    w4_ref, b4_ref, g4_ref, be4_ref,
    wfc_ref, bfc_ref,
    h_ref, pred_ref,
):
    a_bf = a_ref[...]                     # [N, N] bf16 (cast in the wrapper)
    h = x_ref[...]                        # [N, F_in] f32
    h = _gcn_bn_block(a_bf, h, w1_ref, b1_ref, g1_ref, be1_ref)
    h = _gcn_bn_block(a_bf, h, w2_ref, b2_ref, g2_ref, be2_ref)
    h = _gcn_bn_block(a_bf, h, w3_ref, b3_ref, g3_ref, be3_ref)
    h = _gcn_bn_block(a_bf, h, w4_ref, b4_ref, g4_ref, be4_ref)
    h_ref[...] = h                        # forward() output [N, 32]
    # fc head as a VPU reduction: [N,32] * [1,32] -> sum over lanes -> [N,1]
    pred_ref[...] = (
        jnp.sum(h * wfc_ref[...], axis=1, keepdims=True) + bfc_ref[...]
    )


def _full_spec(shape):
    # Whole-array block, no grid -> (8,128) tiling constraint is waived.
    return pl.BlockSpec(shape, lambda: (0,) * len(shape))


def fused_gnn(params, x, a_hat_bf16):
    """Single fused pallas_call. Returns (features [N,32], preds [N,1])."""
    n = x.shape[0]
    inputs = [a_hat_bf16, x]
    specs = [_full_spec(a_hat_bf16.shape), _full_spec(x.shape)]
    for i in range(1, 5):
        w = params[f"conv{i}_w"]
        d_out = w.shape[1]
        b = params[f"conv{i}_b"].reshape(1, d_out)
        g = params[f"bn{i}_gamma"].reshape(1, d_out)
        be = params[f"bn{i}_beta"].reshape(1, d_out)
        inputs += [w, b, g, be]
        specs += [_full_spec(w.shape), _full_spec(b.shape),
                  _full_spec(g.shape), _full_spec(be.shape)]
    wfc = params["fc_w"].reshape(1, 32)   # [32,1] -> row vector for VPU reduce
    bfc = params["fc_b"].reshape(1, 1)
    inputs += [wfc, bfc]
    specs += [_full_spec(wfc.shape), _full_spec(bfc.shape)]

    h, pred = pl.pallas_call(
        _fused_gnn_kernel,
        out_shape=(
            jax.ShapeDtypeStruct((n, 32), jnp.float32),
            jax.ShapeDtypeStruct((n, 1), jnp.float32),
        ),
        in_specs=specs,
        out_specs=(_full_spec((n, 32)), _full_spec((n, 1))),
    )(*inputs)
    return h, pred


# ---------------------------------------------------------------------------
# Model glue (parameter init + adjacency normalization) in plain JAX
# ---------------------------------------------------------------------------
def glorot(key, shape):
    fan_in, fan_out = shape
    limit = jnp.sqrt(6.0 / (fan_in + fan_out))
    return jax.random.uniform(key, shape, jnp.float32, -limit, limit)


def init_params(key, input_dim):
    dims = [(input_dim, 128), (128, 128), (128, 64), (64, 32)]
    params = {}
    keys = jax.random.split(key, len(dims) + 1)
    for i, (din, dout) in enumerate(dims):
        params[f"conv{i+1}_w"] = glorot(keys[i], (din, dout))
        params[f"conv{i+1}_b"] = jnp.zeros((dout,), jnp.float32)
        params[f"bn{i+1}_gamma"] = jnp.ones((dout,), jnp.float32)
        params[f"bn{i+1}_beta"] = jnp.zeros((dout,), jnp.float32)
    params["fc_w"] = glorot(keys[-1], (32, 1))
    params["fc_b"] = jnp.zeros((1,), jnp.float32)
    return params


def normalized_adjacency(edge_index, num_nodes):
    """Dense A_hat = D^-1/2 (A + I) D^-1/2 from a [2, E] edge_index."""
    adj = jnp.zeros((num_nodes, num_nodes), jnp.float32)
    if edge_index.shape[1] > 0:
        adj = adj.at[edge_index[0], edge_index[1]].set(1.0)
    adj = adj + jnp.eye(num_nodes, dtype=jnp.float32)  # self loops
    deg = jnp.sum(adj, axis=1)
    d_inv_sqrt = jnp.where(deg > 0, 1.0 / jnp.sqrt(deg), 0.0)
    return adj * d_inv_sqrt[:, None] * d_inv_sqrt[None, :]


@jax.jit
def gnn_forward(params, x, a_hat):
    h, _ = fused_gnn(params, x, a_hat.astype(jnp.bfloat16))
    return h


@jax.jit
def gnn_predict(params, x, a_hat):
    _, pred = fused_gnn(params, x, a_hat.astype(jnp.bfloat16))
    return pred.squeeze(-1)


# ---------------------------------------------------------------------------
# Demo
# ---------------------------------------------------------------------------
if __name__ == "__main__":
    key = jax.random.PRNGKey(0)
    k_drug, k_mirna, k_params = jax.random.split(key, 3)

    num_nodes = 64
    drug_dim, mirna_dim = 16, 16
    input_dim = drug_dim + mirna_dim  # x = cat([drug_features, mirna_features], 1)

    drug_features = jax.random.normal(k_drug, (num_nodes, drug_dim), jnp.float32)
    mirna_features = jax.random.normal(k_mirna, (num_nodes, mirna_dim), jnp.float32)
    x = jnp.concatenate([drug_features, mirna_features], axis=1)  # [N, 32]

    # Deterministic synthetic graph: bidirectional ring.
    src = jnp.arange(num_nodes, dtype=jnp.int32)
    dst = (src + 1) % num_nodes
    edge_index = jnp.concatenate(
        [jnp.stack([src, dst]), jnp.stack([dst, src])], axis=1
    )  # [2, 2N]

    a_hat = normalized_adjacency(edge_index, num_nodes)
    params = init_params(k_params, input_dim)

    h = gnn_forward(params, x, a_hat)        # forward(): [N, 32]
    preds = gnn_predict(params, x, a_hat)    # predict(): [N]
    jax.block_until_ready((h, preds))

    assert h.shape == (num_nodes, 32) and preds.shape == (num_nodes,)
    assert bool(jnp.all(jnp.isfinite(h))) and bool(jnp.all(jnp.isfinite(preds)))
    print("KERNEL_OK")
</pallas_src>

<mosaic_0001>
module attributes {stable_mosaic.version = 11 : i64} {
  func.func @_fused_gnn_kernel(%arg0: memref<64x64xbf16, #tpu.memory_space<vmem>>, %arg1: memref<64x32xf32, #tpu.memory_space<vmem>>, %arg2: memref<32x128xf32, #tpu.memory_space<vmem>>, %arg3: memref<1x128xf32, #tpu.memory_space<vmem>>, %arg4: memref<1x128xf32, #tpu.memory_space<vmem>>, %arg5: memref<1x128xf32, #tpu.memory_space<vmem>>, %arg6: memref<128x128xf32, #tpu.memory_space<vmem>>, %arg7: memref<1x128xf32, #tpu.memory_space<vmem>>, %arg8: memref<1x128xf32, #tpu.memory_space<vmem>>, %arg9: memref<1x128xf32, #tpu.memory_space<vmem>>, %arg10: memref<128x64xf32, #tpu.memory_space<vmem>>, %arg11: memref<1x64xf32, #tpu.memory_space<vmem>>, %arg12: memref<1x64xf32, #tpu.memory_space<vmem>>, %arg13: memref<1x64xf32, #tpu.memory_space<vmem>>, %arg14: memref<64x32xf32, #tpu.memory_space<vmem>>, %arg15: memref<1x32xf32, #tpu.memory_space<vmem>>, %arg16: memref<1x32xf32, #tpu.memory_space<vmem>>, %arg17: memref<1x32xf32, #tpu.memory_space<vmem>>, %arg18: memref<1x32xf32, #tpu.memory_space<vmem>>, %arg19: memref<1x1xf32, #tpu.memory_space<vmem>>, %arg20: memref<64x32xf32, #tpu.memory_space<vmem>>, %arg21: memref<64x1xf32, #tpu.memory_space<vmem>>) attributes {dimension_semantics = [], scalar_prefetch = 0 : i64, scratch_operands = 0 : i64, tpu.core_type = #tpu.core_type<tc>} {
    %c0 = arith.constant 0 : index
    %c0_0 = arith.constant 0 : index
    %0 = vector.load %arg0[%c0, %c0_0] : memref<64x64xbf16, #tpu.memory_space<vmem>>, vector<64x64xbf16>
    %c0_1 = arith.constant 0 : index
    %c0_2 = arith.constant 0 : index
    %1 = vector.load %arg1[%c0_1, %c0_2] : memref<64x32xf32, #tpu.memory_space<vmem>>, vector<64x32xf32>
    %2 = arith.truncf %1 : vector<64x32xf32> to vector<64x32xbf16>
    %c0_3 = arith.constant 0 : index
    %c0_4 = arith.constant 0 : index
    %3 = vector.load %arg2[%c0_3, %c0_4] : memref<32x128xf32, #tpu.memory_space<vmem>>, vector<32x128xf32>
    %4 = arith.truncf %3 : vector<32x128xf32> to vector<32x128xbf16>
    %cst = arith.constant dense<0.000000e+00> : vector<64x32xf32>
    %5 = tpu.matmul %0, %2, %cst {dimension_numbers = #tpu.dot_dimension_numbers<[1], [0], [0], [1], [0, 0, 1, 1], [], []>} : vector<64x64xbf16>, vector<64x32xbf16>, vector<64x32xf32> -> vector<64x32xf32>
    %6 = arith.truncf %5 : vector<64x32xf32> to vector<64x32xbf16>
    %cst_5 = arith.constant dense<0.000000e+00> : vector<64x128xf32>
    %7 = tpu.matmul %6, %4, %cst_5 {dimension_numbers = #tpu.dot_dimension_numbers<[1], [0], [0], [1], [0, 0, 1, 1], [], []>} : vector<64x32xbf16>, vector<32x128xbf16>, vector<64x128xf32> -> vector<64x128xf32>
    %c0_6 = arith.constant 0 : index
    %c0_7 = arith.constant 0 : index
    %8 = vector.load %arg3[%c0_6, %c0_7] : memref<1x128xf32, #tpu.memory_space<vmem>>, vector<1x128xf32>
    %9 = vector.broadcast %8 : vector<1x128xf32> to vector<64x128xf32>
    %10 = arith.addf %7, %9 : vector<64x128xf32>
    %cst_8 = arith.constant 0.000000e+00 : f32
    %11 = vector.broadcast %cst_8 : f32 to vector<64x128xf32>
    %12 = arith.maximumf %10, %11 : vector<64x128xf32>
    %cst_9 = arith.constant dense<0.000000e+00> : vector<128xf32>
    %13 = vector.multi_reduction <add>, %12, %cst_9 [0] : vector<64x128xf32> to vector<128xf32>
    %14 = vector.shape_cast %13 : vector<128xf32> to vector<1x128xf32>
    %cst_10 = arith.constant 6.400000e+01 : f32
    %15 = vector.broadcast %cst_10 : f32 to vector<1x128xf32>
    %16 = arith.divf %14, %15 : vector<1x128xf32>
    %17 = vector.broadcast %16 : vector<1x128xf32> to vector<64x128xf32>
    %18 = arith.subf %12, %17 : vector<64x128xf32>
    %19 = arith.mulf %18, %18 : vector<64x128xf32>
    %cst_11 = arith.constant dense<0.000000e+00> : vector<128xf32>
    %20 = vector.multi_reduction <add>, %19, %cst_11 [0] : vector<64x128xf32> to vector<128xf32>
    %21 = vector.shape_cast %20 : vector<128xf32> to vector<1x128xf32>
    %cst_12 = arith.constant 6.400000e+01 : f32
    %22 = vector.broadcast %cst_12 : f32 to vector<1x128xf32>
    %23 = arith.divf %21, %22 : vector<1x128xf32>
    %c0_13 = arith.constant 0 : index
    %c0_14 = arith.constant 0 : index
    %24 = vector.load %arg4[%c0_13, %c0_14] : memref<1x128xf32, #tpu.memory_space<vmem>>, vector<1x128xf32>
    %cst_15 = arith.constant 9.99999974E-6 : f32
    %25 = vector.broadcast %cst_15 : f32 to vector<1x128xf32>
    %26 = arith.addf %23, %25 : vector<1x128xf32>
    %27 = math.rsqrt %26 : vector<1x128xf32>
    %28 = arith.mulf %24, %27 : vector<1x128xf32>
    %c0_16 = arith.constant 0 : index
    %c0_17 = arith.constant 0 : index
    %29 = vector.load %arg5[%c0_16, %c0_17] : memref<1x128xf32, #tpu.memory_space<vmem>>, vector<1x128xf32>
    %30 = arith.mulf %16, %28 : vector<1x128xf32>
    %31 = arith.subf %29, %30 : vector<1x128xf32>
    %32 = vector.broadcast %28 : vector<1x128xf32> to vector<64x128xf32>
    %33 = arith.mulf %12, %32 : vector<64x128xf32>
    %34 = vector.broadcast %31 : vector<1x128xf32> to vector<64x128xf32>
    %35 = arith.addf %33, %34 : vector<64x128xf32>
    %36 = arith.truncf %35 : vector<64x128xf32> to vector<64x128xbf16>
    %c0_18 = arith.constant 0 : index
    %c0_19 = arith.constant 0 : index
    %37 = vector.load %arg6[%c0_18, %c0_19] : memref<128x128xf32, #tpu.memory_space<vmem>>, vector<128x128xf32>
    %38 = arith.truncf %37 : vector<128x128xf32> to vector<128x128xbf16>
    %cst_20 = arith.constant dense<0.000000e+00> : vector<64x128xf32>
    %39 = tpu.matmul %36, %38, %cst_20 {dimension_numbers = #tpu.dot_dimension_numbers<[1], [0], [0], [1], [0, 0, 1, 1], [], []>} : vector<64x128xbf16>, vector<128x128xbf16>, vector<64x128xf32> -> vector<64x128xf32>
    %40 = arith.truncf %39 : vector<64x128xf32> to vector<64x128xbf16>
    %cst_21 = arith.constant dense<0.000000e+00> : vector<64x128xf32>
    %41 = tpu.matmul %0, %40, %cst_21 {dimension_numbers = #tpu.dot_dimension_numbers<[1], [0], [0], [1], [0, 0, 1, 1], [], []>} : vector<64x64xbf16>, vector<64x128xbf16>, vector<64x128xf32> -> vector<64x128xf32>
    %c0_22 = arith.constant 0 : index
    %c0_23 = arith.constant 0 : index
    %42 = vector.load %arg7[%c0_22, %c0_23] : memref<1x128xf32, #tpu.memory_space<vmem>>, vector<1x128xf32>
    %43 = vector.broadcast %42 : vector<1x128xf32> to vector<64x128xf32>
    %44 = arith.addf %41, %43 : vector<64x128xf32>
    %cst_24 = arith.constant 0.000000e+00 : f32
    %45 = vector.broadcast %cst_24 : f32 to vector<64x128xf32>
    %46 = arith.maximumf %44, %45 : vector<64x128xf32>
    %cst_25 = arith.constant dense<0.000000e+00> : vector<128xf32>
    %47 = vector.multi_reduction <add>, %46, %cst_25 [0] : vector<64x128xf32> to vector<128xf32>
    %48 = vector.shape_cast %47 : vector<128xf32> to vector<1x128xf32>
    %cst_26 = arith.constant 6.400000e+01 : f32
    %49 = vector.broadcast %cst_26 : f32 to vector<1x128xf32>
    %50 = arith.divf %48, %49 : vector<1x128xf32>
    %51 = vector.broadcast %50 : vector<1x128xf32> to vector<64x128xf32>
    %52 = arith.subf %46, %51 : vector<64x128xf32>
    %53 = arith.mulf %52, %52 : vector<64x128xf32>
    %cst_27 = arith.constant dense<0.000000e+00> : vector<128xf32>
    %54 = vector.multi_reduction <add>, %53, %cst_27 [0] : vector<64x128xf32> to vector<128xf32>
    %55 = vector.shape_cast %54 : vector<128xf32> to vector<1x128xf32>
    %cst_28 = arith.constant 6.400000e+01 : f32
    %56 = vector.broadcast %cst_28 : f32 to vector<1x128xf32>
    %57 = arith.divf %55, %56 : vector<1x128xf32>
    %c0_29 = arith.constant 0 : index
    %c0_30 = arith.constant 0 : index
    %58 = vector.load %arg8[%c0_29, %c0_30] : memref<1x128xf32, #tpu.memory_space<vmem>>, vector<1x128xf32>
    %cst_31 = arith.constant 9.99999974E-6 : f32
    %59 = vector.broadcast %cst_31 : f32 to vector<1x128xf32>
    %60 = arith.addf %57, %59 : vector<1x128xf32>
    %61 = math.rsqrt %60 : vector<1x128xf32>
    %62 = arith.mulf %58, %61 : vector<1x128xf32>
    %c0_32 = arith.constant 0 : index
    %c0_33 = arith.constant 0 : index
    %63 = vector.load %arg9[%c0_32, %c0_33] : memref<1x128xf32, #tpu.memory_space<vmem>>, vector<1x128xf32>
    %64 = arith.mulf %50, %62 : vector<1x128xf32>
    %65 = arith.subf %63, %64 : vector<1x128xf32>
    %66 = vector.broadcast %62 : vector<1x128xf32> to vector<64x128xf32>
    %67 = arith.mulf %46, %66 : vector<64x128xf32>
    %68 = vector.broadcast %65 : vector<1x128xf32> to vector<64x128xf32>
    %69 = arith.addf %67, %68 : vector<64x128xf32>
    %70 = arith.truncf %69 : vector<64x128xf32> to vector<64x128xbf16>
    %c0_34 = arith.constant 0 : index
    %c0_35 = arith.constant 0 : index
    %71 = vector.load %arg10[%c0_34, %c0_35] : memref<128x64xf32, #tpu.memory_space<vmem>>, vector<128x64xf32>
    %72 = arith.truncf %71 : vector<128x64xf32> to vector<128x64xbf16>
    %cst_36 = arith.constant dense<0.000000e+00> : vector<64x64xf32>
    %73 = tpu.matmul %70, %72, %cst_36 {dimension_numbers = #tpu.dot_dimension_numbers<[1], [0], [0], [1], [0, 0, 1, 1], [], []>} : vector<64x128xbf16>, vector<128x64xbf16>, vector<64x64xf32> -> vector<64x64xf32>
    %74 = arith.truncf %73 : vector<64x64xf32> to vector<64x64xbf16>
    %cst_37 = arith.constant dense<0.000000e+00> : vector<64x64xf32>
    %75 = tpu.matmul %0, %74, %cst_37 {dimension_numbers = #tpu.dot_dimension_numbers<[1], [0], [0], [1], [0, 0, 1, 1], [], []>} : vector<64x64xbf16>, vector<64x64xbf16>, vector<64x64xf32> -> vector<64x64xf32>
    %c0_38 = arith.constant 0 : index
    %c0_39 = arith.constant 0 : index
    %76 = vector.load %arg11[%c0_38, %c0_39] : memref<1x64xf32, #tpu.memory_space<vmem>>, vector<1x64xf32>
    %77 = vector.broadcast %76 : vector<1x64xf32> to vector<64x64xf32>
    %78 = arith.addf %75, %77 : vector<64x64xf32>
    %cst_40 = arith.constant 0.000000e+00 : f32
    %79 = vector.broadcast %cst_40 : f32 to vector<64x64xf32>
    %80 = arith.maximumf %78, %79 : vector<64x64xf32>
    %cst_41 = arith.constant dense<0.000000e+00> : vector<64xf32>
    %81 = vector.multi_reduction <add>, %80, %cst_41 [0] : vector<64x64xf32> to vector<64xf32>
    %82 = vector.shape_cast %81 : vector<64xf32> to vector<1x64xf32>
    %cst_42 = arith.constant 6.400000e+01 : f32
    %83 = vector.broadcast %cst_42 : f32 to vector<1x64xf32>
    %84 = arith.divf %82, %83 : vector<1x64xf32>
    %85 = vector.broadcast %84 : vector<1x64xf32> to vector<64x64xf32>
    %86 = arith.subf %80, %85 : vector<64x64xf32>
    %87 = arith.mulf %86, %86 : vector<64x64xf32>
    %cst_43 = arith.constant dense<0.000000e+00> : vector<64xf32>
    %88 = vector.multi_reduction <add>, %87, %cst_43 [0] : vector<64x64xf32> to vector<64xf32>
    %89 = vector.shape_cast %88 : vector<64xf32> to vector<1x64xf32>
    %cst_44 = arith.constant 6.400000e+01 : f32
    %90 = vector.broadcast %cst_44 : f32 to vector<1x64xf32>
    %91 = arith.divf %89, %90 : vector<1x64xf32>
    %c0_45 = arith.constant 0 : index
    %c0_46 = arith.constant 0 : index
    %92 = vector.load %arg12[%c0_45, %c0_46] : memref<1x64xf32, #tpu.memory_space<vmem>>, vector<1x64xf32>
    %cst_47 = arith.constant 9.99999974E-6 : f32
    %93 = vector.broadcast %cst_47 : f32 to vector<1x64xf32>
    %94 = arith.addf %91, %93 : vector<1x64xf32>
    %95 = math.rsqrt %94 : vector<1x64xf32>
    %96 = arith.mulf %92, %95 : vector<1x64xf32>
    %c0_48 = arith.constant 0 : index
    %c0_49 = arith.constant 0 : index
    %97 = vector.load %arg13[%c0_48, %c0_49] : memref<1x64xf32, #tpu.memory_space<vmem>>, vector<1x64xf32>
    %98 = arith.mulf %84, %96 : vector<1x64xf32>
    %99 = arith.subf %97, %98 : vector<1x64xf32>
    %100 = vector.broadcast %96 : vector<1x64xf32> to vector<64x64xf32>
    %101 = arith.mulf %80, %100 : vector<64x64xf32>
    %102 = vector.broadcast %99 : vector<1x64xf32> to vector<64x64xf32>
    %103 = arith.addf %101, %102 : vector<64x64xf32>
    %104 = arith.truncf %103 : vector<64x64xf32> to vector<64x64xbf16>
    %c0_50 = arith.constant 0 : index
    %c0_51 = arith.constant 0 : index
    %105 = vector.load %arg14[%c0_50, %c0_51] : memref<64x32xf32, #tpu.memory_space<vmem>>, vector<64x32xf32>
    %106 = arith.truncf %105 : vector<64x32xf32> to vector<64x32xbf16>
    %cst_52 = arith.constant dense<0.000000e+00> : vector<64x32xf32>
    %107 = tpu.matmul %104, %106, %cst_52 {dimension_numbers = #tpu.dot_dimension_numbers<[1], [0], [0], [1], [0, 0, 1, 1], [], []>} : vector<64x64xbf16>, vector<64x32xbf16>, vector<64x32xf32> -> vector<64x32xf32>
    %108 = arith.truncf %107 : vector<64x32xf32> to vector<64x32xbf16>
    %cst_53 = arith.constant dense<0.000000e+00> : vector<64x32xf32>
    %109 = tpu.matmul %0, %108, %cst_53 {dimension_numbers = #tpu.dot_dimension_numbers<[1], [0], [0], [1], [0, 0, 1, 1], [], []>} : vector<64x64xbf16>, vector<64x32xbf16>, vector<64x32xf32> -> vector<64x32xf32>
    %c0_54 = arith.constant 0 : index
    %c0_55 = arith.constant 0 : index
    %110 = vector.load %arg15[%c0_54, %c0_55] : memref<1x32xf32, #tpu.memory_space<vmem>>, vector<1x32xf32>
    %111 = vector.broadcast %110 : vector<1x32xf32> to vector<64x32xf32>
    %112 = arith.addf %109, %111 : vector<64x32xf32>
    %cst_56 = arith.constant 0.000000e+00 : f32
    %113 = vector.broadcast %cst_56 : f32 to vector<64x32xf32>
    %114 = arith.maximumf %112, %113 : vector<64x32xf32>
    %cst_57 = arith.constant dense<0.000000e+00> : vector<32xf32>
    %115 = vector.multi_reduction <add>, %114, %cst_57 [0] : vector<64x32xf32> to vector<32xf32>
    %116 = vector.shape_cast %115 : vector<32xf32> to vector<1x32xf32>
    %cst_58 = arith.constant 6.400000e+01 : f32
    %117 = vector.broadcast %cst_58 : f32 to vector<1x32xf32>
    %118 = arith.divf %116, %117 : vector<1x32xf32>
    %119 = vector.broadcast %118 : vector<1x32xf32> to vector<64x32xf32>
    %120 = arith.subf %114, %119 : vector<64x32xf32>
    %121 = arith.mulf %120, %120 : vector<64x32xf32>
    %cst_59 = arith.constant dense<0.000000e+00> : vector<32xf32>
    %122 = vector.multi_reduction <add>, %121, %cst_59 [0] : vector<64x32xf32> to vector<32xf32>
    %123 = vector.shape_cast %122 : vector<32xf32> to vector<1x32xf32>
    %cst_60 = arith.constant 6.400000e+01 : f32
    %124 = vector.broadcast %cst_60 : f32 to vector<1x32xf32>
    %125 = arith.divf %123, %124 : vector<1x32xf32>
    %c0_61 = arith.constant 0 : index
    %c0_62 = arith.constant 0 : index
    %126 = vector.load %arg16[%c0_61, %c0_62] : memref<1x32xf32, #tpu.memory_space<vmem>>, vector<1x32xf32>
    %cst_63 = arith.constant 9.99999974E-6 : f32
    %127 = vector.broadcast %cst_63 : f32 to vector<1x32xf32>
    %128 = arith.addf %125, %127 : vector<1x32xf32>
    %129 = math.rsqrt %128 : vector<1x32xf32>
    %130 = arith.mulf %126, %129 : vector<1x32xf32>
    %c0_64 = arith.constant 0 : index
    %c0_65 = arith.constant 0 : index
    %131 = vector.load %arg17[%c0_64, %c0_65] : memref<1x32xf32, #tpu.memory_space<vmem>>, vector<1x32xf32>
    %132 = arith.mulf %118, %130 : vector<1x32xf32>
    %133 = arith.subf %131, %132 : vector<1x32xf32>
    %134 = vector.broadcast %130 : vector<1x32xf32> to vector<64x32xf32>
    %135 = arith.mulf %114, %134 : vector<64x32xf32>
    %136 = vector.broadcast %133 : vector<1x32xf32> to vector<64x32xf32>
    %137 = arith.addf %135, %136 : vector<64x32xf32>
    %c0_66 = arith.constant 0 : index
    %c0_67 = arith.constant 0 : index
    %138 = vector.load %arg20[%c0_66, %c0_67] : memref<64x32xf32, #tpu.memory_space<vmem>>, vector<64x32xf32>
    tpu.vector_store %arg20[%c0_66, %c0_67], %137 {strides = array<i32>} : memref<64x32xf32, #tpu.memory_space<vmem>>, vector<64x32xf32>,
    %c0_68 = arith.constant 0 : index
    %c0_69 = arith.constant 0 : index
    %139 = vector.load %arg18[%c0_68, %c0_69] : memref<1x32xf32, #tpu.memory_space<vmem>>, vector<1x32xf32>
    %140 = vector.broadcast %139 : vector<1x32xf32> to vector<64x32xf32>
    %141 = arith.mulf %137, %140 : vector<64x32xf32>
    %cst_70 = arith.constant dense<0.000000e+00> : vector<64xf32>
    %142 = vector.multi_reduction <add>, %141, %cst_70 [1] : vector<64x32xf32> to vector<64xf32>
    %143 = vector.shape_cast %142 : vector<64xf32> to vector<64x1xf32>
    %c0_71 = arith.constant 0 : index
    %c0_72 = arith.constant 0 : index
    %144 = vector.load %arg19[%c0_71, %c0_72] : memref<1x1xf32, #tpu.memory_space<vmem>>, vector<1x1xf32>
    %145 = vector.broadcast %144 : vector<1x1xf32> to vector<64x1xf32>
    %146 = arith.addf %143, %145 : vector<64x1xf32>
    %c0_73 = arith.constant 0 : index
    %c0_74 = arith.constant 0 : index
    %147 = vector.load %arg21[%c0_73, %c0_74] : memref<64x1xf32, #tpu.memory_space<vmem>>, vector<64x1xf32>
    tpu.vector_store %arg21[%c0_73, %c0_74], %146 {strides = array<i32>} : memref<64x1xf32, #tpu.memory_space<vmem>>, vector<64x1xf32>,
    return
  }
}

</mosaic_0001>

<bundles_post_ra>
// kernel: gnn_forward.1
= control target key start
LH: loop header
LB: loop body
LE: loop exit
PB: predicated region body
PF: predicated region fallthrough
CT: control target
= control target key end

     0   :  { %s2178_s0 = inlined_call_operand.vmem [shape: bf16[64,64], index: 0, kind: input, shape index: {}]   ;;  %s2179_s1 = inlined_call_operand.vmem [shape: f32[64,32], index: 1, kind: input, shape index: {}]   ;;  %s2180_s2 = inlined_call_operand.vmem [shape: f32[32,128], index: 2, kind: input, shape index: {}]   ;;  %s2181_s3 = inlined_call_operand.vmem [shape: f32[1,128], index: 3, kind: input, shape index: {}]   ;;  %s2182_s4 = inlined_call_operand.vmem [shape: f32[1,128], index: 4, kind: input, shape index: {}]   ;;  %s2183_s5 = inlined_call_operand.vmem [shape: f32[1,128], index: 5, kind: input, shape index: {}]   ;;  %s2184_s6 = inlined_call_operand.vmem [shape: f32[128,128], index: 6, kind: input, shape index: {}]   ;;  %s2185_s7 = inlined_call_operand.vmem [shape: f32[1,128], index: 7, kind: input, shape index: {}]   ;;  %s2186_s8 = inlined_call_operand.vmem [shape: f32[1,128], index: 8, kind: input, shape index: {}]   ;;  %s2187_s9 = inlined_call_operand.vmem [shape: f32[1,128], index: 9, kind: input, shape index: {}]   ;;  %s2188_s10 = inlined_call_operand.vmem [shape: f32[128,64], index: 10, kind: input, shape index: {}]   ;;  %s2189_s11 = inlined_call_operand.vmem [shape: f32[1,64], index: 11, kind: input, shape index: {}]   ;;  %s2190_s12 = inlined_call_operand.vmem [shape: f32[1,64], index: 12, kind: input, shape index: {}]   ;;  %s2191_s13 = inlined_call_operand.vmem [shape: f32[1,64], index: 13, kind: input, shape index: {}]   ;;  %s2192_s14 = inlined_call_operand.vmem [shape: f32[64,32], index: 14, kind: input, shape index: {}]   ;;  %s2193_s15 = inlined_call_operand.vmem [shape: f32[1,32], index: 15, kind: input, shape index: {}]   ;;  %s2194_s16 = inlined_call_operand.vmem [shape: f32[1,32], index: 16, kind: input, shape index: {}]   ;;  %s2195_s17 = inlined_call_operand.vmem [shape: f32[1,32], index: 17, kind: input, shape index: {}]   ;;  %s2196_s18 = inlined_call_operand.vmem [shape: f32[1,32], index: 18, kind: input, shape index: {}]   ;;  %s2197_s19 = inlined_call_operand.<no memory space> [shape: f32[1,1], index: 19, kind: input, shape index: {}]   ;;  %s2198_s20 = inlined_call_operand.vmem [shape: f32[64,32], index: 20, kind: output, shape index: {0}]   ;;  %s2199_s21 = inlined_call_operand.hbm [shape: f32[64,1], index: 21, kind: output, shape index: {1}]  }
   0x1   :  { %2203 = sst [smem:[#allocation6_spill]] %s2178_s0  ;;  %v27_v0 = vstv %s2197_s19 }
   0x2   :  { %2204 = sst [smem:[#allocation7_spill]] %s2179_s1  ;;  %28 = vst [vmem:[#allocation2] sm:$0x1] %v27_v0 }
   0x3   :  { %2205 = sst [smem:[#allocation8_spill]] %s2180_s2 }
   0x4   :  { %2206 = sst [smem:[#allocation9_spill]] %s2181_s3 }
   0x5   :  { %2207 = sst [smem:[#allocation10_spill]] %s2182_s4 }
   0x6   :  { %2208 = sst [smem:[#allocation11_spill]] %s2183_s5 }
   0x7   :  { %s2209_s3 = sld [smem:[#allocation7_spill]]  ;;  %vm117_vm0 = vcmask 523264   ;;  %s2210_s25 = sld [smem:[#allocation6_spill]] }
   0x8   :  { %s2211_s30 = sld [smem:[#allocation8_spill]] }
   0xd   :  { %v79_v1 = vld [vmem:[%s2209_s3] sm:$0xff]  ;;  %v80_v2 = vld [vmem:[%s2209_s3 + $0x8] sm:$0xff]  ;;  %v81_v3 = vld [vmem:[%s2209_s3 + $0x10] sm:$0xff] }
   0xe   :  { %v87_v4 = vpack.c.bf16 %v80_v2, %v79_v1  ;;  %v82_v5 = vld [vmem:[%s2209_s3 + $0x18] sm:$0xff]  ;;  %v83_v7 = vld [vmem:[%s2209_s3 + $0x20] sm:$0xff]  ;;  %v84_v8 = vld [vmem:[%s2209_s3 + $0x28] sm:$0xff] }
   0xf   :  { %v88_v6 = vpack.c.bf16 %v82_v5, %v81_v3  ;;  %v1686_v9 = vld [vmem:[%s2210_s25] sm:$0xff]   ;;  %v89_v10 = vpack.c.bf16 %v84_v8, %v83_v7  ;;  %v85_v11 = vld [vmem:[%s2209_s3 + $0x30] sm:$0xff]  ;;  %v86_v12 = vld [vmem:[%s2209_s3 + $0x38] sm:$0xff] }
  0x10   :  { %1367 = vmatprep.subr.bf16.mxu0 %v87_v4  ;;  %1375 = vmatprep.mubr.msk.bf16.mxu0 %vm117_vm0, %v1686_v9  ;;  %v91_v13 = vld [vmem:[%s2211_s30] sm:$0xff]  ;;  %v92_v14 = vld [vmem:[%s2211_s30 + $0x8] sm:$0xff] }
  0x11   :  { %1368 = vmatpush3.bf16.msra.mxu0 %v87_v4 }
  0x12   :  { %1369 = vmatprep.subr.bf16.mxu0 %v88_v6 }
  0x13   :  { %29 = vsyncpa [#allocation4], 0  ;;  %v95_v15 = vpack.c.bf16 %v92_v14, %v91_v13  ;;  %v90_v16 = vpack.c.bf16 %v86_v12, %v85_v11  ;;  %v1705_v17 = vld [vmem:[%s2210_s25 + $0x8] sm:$0xff]   ;;  %v1710_v18 = vld [vmem:[%s2210_s25 + $0x10] sm:$0xff]   ;;  %vm206_vm1 = vcmask 261120   ;;  %s2212_s19 = sld [smem:[#allocation9_spill]] }
  0x14   :  { %v1719_v19 = vld [vmem:[%s2210_s25 + $0x18] sm:$0xff]   ;;  %v93_v20 = vld [vmem:[%s2211_s30 + $0x10] sm:$0xff]  ;;  %v376_v35 = vld [vmem:[%s2184_s6] sm:$0xff]  ;;  %s2213_s23 = sld [smem:[#allocation10_spill]]  ;;  %s2214_s24 = sld [smem:[#allocation11_spill]]  ;;  %vm1234_vm2 = vcmask 7168  }
  0x15   :  { %1370 = vmatpush3.bf16.msra.mxu0 %v88_v6  ;;  %1383 = vmatprep.subr.bf16.mxu1 %v95_v15  ;;  %v94_v21 = vld [vmem:[%s2211_s30 + $0x18] sm:$0xff]  ;;  %v377_v36 = vld [vmem:[%s2184_s6 + $0x8] sm:$0xff]  ;;  %v378_v38 = vld [vmem:[%s2184_s6 + $0x10] sm:$0xff] }
  0x16   :  { %1371 = vmatprep.subr.bf16.mxu0 %v89_v10  ;;  %1384 = vmatpush3.bf16.msra.mxu1 %v95_v15  ;;  %v96_v22 = vpack.c.bf16 %v94_v21, %v93_v20  ;;  %v392_v37 = vpack.c.bf16 %v377_v36, %v376_v35  ;;  %v379_v39 = vld [vmem:[%s2184_s6 + $0x18] sm:$0xff]  ;;  %v380_v41 = vld [vmem:[%s2184_s6 + $0x20] sm:$0xff]  ;;  %v381_v42 = vld [vmem:[%s2184_s6 + $0x28] sm:$0xff] }
  0x17   :  { %v393_v40 = vpack.c.bf16 %v379_v39, %v378_v38  ;;  %v394_v43 = vpack.c.bf16 %v381_v42, %v380_v41  ;;  %v382_v44 = vld [vmem:[%s2184_s6 + $0x30] sm:$0xff]  ;;  %v383_v45 = vld [vmem:[%s2184_s6 + $0x38] sm:$0xff]  ;;  %v384_v47 = vld [vmem:[%s2184_s6 + $0x40] sm:$0xff] }
  0x18   :  { %1385 = vmatprep.subr.bf16.mxu1 %v96_v22  ;;  %v395_v46 = vpack.c.bf16 %v383_v45, %v382_v44  ;;  %v385_v48 = vld [vmem:[%s2184_s6 + $0x48] sm:$0xff]  ;;  %v386_v50 = vld [vmem:[%s2184_s6 + $0x50] sm:$0xff]  ;;  %v387_v51 = vld [vmem:[%s2184_s6 + $0x58] sm:$0xff] }
  0x19   :  { %1372 = vmatpush3.bf16.msra.mxu0 %v89_v10  ;;  %v396_v49 = vpack.c.bf16 %v385_v48, %v384_v47  ;;  %v397_v52 = vpack.c.bf16 %v387_v51, %v386_v50  ;;  %v388_v53 = vld [vmem:[%s2184_s6 + $0x60] sm:$0xff]  ;;  %v389_v54 = vld [vmem:[%s2184_s6 + $0x68] sm:$0xff]  ;;  %v390_v56 = vld [vmem:[%s2184_s6 + $0x70] sm:$0xff] }
  0x1a   :  { %1373 = vmatprep.subr.bf16.mxu0 %v90_v16  ;;  %1386 = vmatpush3.bf16.msra.mxu1 %v96_v22  ;;  %v398_v55 = vpack.c.bf16 %v389_v54, %v388_v53  ;;  %v391_v57 = vld [vmem:[%s2184_s6 + $0x78] sm:$0xff]  ;;  %v1271_v59 = vld [vmem:[%s2212_s19] ss:$0 sm:$0xff] }
  0x1b   :  { %1395 = vmatprep.subr.bf16.mxu1 %v392_v37  ;;  %v399_v58 = vpack.c.bf16 %v391_v57, %v390_v56 }
  0x1d   :  { %1374 = vmatpush3.bf16.msra.mxu0 %v90_v16 }
  0x20   :  { %1376 = vmatmul.mubr.msk.bf16.vlgmr.msra.gmra.mrb[0].mxu0 %vm117_vm0, %v1705_v17 }
  0x21   :  { %1379 = vmatprep.mubr.msk.bf16.mxu0 %vm117_vm0, %v1710_v18 }
  0x28   :  { %1380 = vmatmul.mubr.msk.bf16.gmra.mrb[4].mxu0 %vm117_vm0, %v1719_v19 }
  0x29   :  { %1427 = vmatprep.mubr.msk.bf16.mxu0 %vm117_vm0, %v1686_v9 }
  0xf3   :  { %v1377_v23 = vpop.f32.mrb[0].mxu0 }
  0xf4   :  { %v164_v24 = vpop.f32.mrb[1].mxu0 }
  0xf5   :  { %v1378_v25 = vpop.f32.mrb[2].mxu0 }
  0xf6   :  { %v196_v26 = vpack.c.bf16 %v1378_v25, %v1377_v23  ;;  %v167_v27 = vpop.f32.mrb[3].mxu0 }
  0xf7   :  { %v195_v28 = vpack.c.bf16 %v167_v27, %v164_v24 }
  0xf9   :  { %1387 = vmatprep.mubr.msk.bf16.mxu1 %vm206_vm1, %v195_v28 }
  0xfa   :  { %1388 = vmatmul.mubr.msk.bf16.vlgmr.msra.gmra.mrb[0].mxu1 %vm206_vm1, %v196_v26 }
  0xfb   :  { %v1381_v29 = vpop.f32.mrb[4].mxu0  ;;  %1396 = vmatpush3.bf16.msra.mxu1 %v392_v37 }
  0xfc   :  { %v180_v30 = vpop.f32.mrb[5].mxu0  ;;  %1397 = vmatprep.subr.bf16.mxu1 %v393_v40 }
  0xfd   :  { %v1382_v31 = vpop.f32.mrb[6].mxu0 }
  0xfe   :  { %v198_v32 = vpack.c.bf16 %v1382_v31, %v1381_v29  ;;  %v183_v33 = vpop.f32.mrb[7].mxu0 }
  0xff   :  { %v197_v34 = vpack.c.bf16 %v183_v33, %v180_v30  ;;  %1398 = vmatpush3.bf16.msra.mxu1 %v393_v40 }
 0x100   :  { %1399 = vmatprep.subr.bf16.mxu1 %v394_v43 }
 0x101   :  { %1391 = vmatprep.mubr.msk.bf16.mxu1 %vm206_vm1, %v197_v34 }
 0x102   :  { %1392 = vmatmul.mubr.msk.bf16.gmra.mrb[4].mxu1 %vm206_vm1, %v198_v32 }
 0x103   :  { %1400 = vmatpush3.bf16.msra.mxu1 %v394_v43 }
 0x104   :  { %1401 = vmatprep.subr.bf16.mxu1 %v395_v46 }
 0x107   :  { %1402 = vmatpush3.bf16.msra.mxu1 %v395_v46 }
 0x108   :  { %1403 = vmatprep.subr.bf16.mxu1 %v396_v49 }
 0x10b   :  { %1404 = vmatpush3.bf16.msra.mxu1 %v396_v49 }
 0x10c   :  { %1405 = vmatprep.subr.bf16.mxu1 %v397_v52 }
 0x10f   :  { %1406 = vmatpush3.bf16.msra.mxu1 %v397_v52 }
 0x110   :  { %1407 = vmatprep.subr.bf16.mxu1 %v398_v55 }
 0x113   :  { %1408 = vmatpush3.bf16.msra.mxu1 %v398_v55 }
 0x114   :  { %1409 = vmatprep.subr.bf16.mxu1 %v399_v58 }
 0x117   :  { %1410 = vmatpush3.bf16.msra.mxu1 %v399_v58 }
 0x1cd   :  { %v1389_v60 = vpop.f32.mrb[0].mxu1 }
 0x1ce   :  { %v253_v61 = vpop.f32.mrb[1].mxu1  ;;  %v262_v1 = vadd.f32 %v1389_v60, %v1271_v59 }
 0x1cf   :  { %v254_v62 = vadd.f32 %v1271_v59, %v253_v61  ;;  %v1390_v63 = vpop.f32.mrb[2].mxu1 }
 0x1d0   :  { %v256_v0 = vpop.f32.mrb[3].mxu1  ;;  %v265_v4 = vadd.f32 %v1390_v63, %v1271_v59  ;;  %v1790_v6 = vmax.f32 %v262_v1, 0.0 }
 0x1d1   :  { %v257_v2 = vadd.f32 %v1271_v59, %v256_v0  ;;  %v1786_v3 = vmax.f32 %v254_v62, 0.0 }
 0x1d2   :  { %v1794_v11 = vmax.f32 %v265_v4, 0.0 }
 0x1d3   :  { %v1788_v5 = vmax.f32 %v257_v2, 0.0 }
 0x1d5   :  { %v292_v7 = vadd.f32 %v1788_v5, %v1786_v3  ;;  %v1393_v8 = vpop.f32.mrb[4].mxu1 }
 0x1d6   :  { %v269_v10 = vpop.f32.mrb[5].mxu1  ;;  %v278_v16 = vadd.f32 %v1393_v8, %v1271_v59  ;;  %v345_v8 = vlaneseq }
 0x1d7   :  { %v293_v12 = vadd.f32 %v292_v7, %v1790_v6  ;;  %v270_v13 = vadd.f32 %v1271_v59, %v269_v10  ;;  %v1394_v14 = vpop.f32.mrb[6].mxu1 }
 0x1d8   :  { %v272_v15 = vpop.f32.mrb[7].mxu1  ;;  %v281_v24 = vadd.f32 %v1394_v14, %v1271_v59  ;;  %v1801_v26 = vmax.f32 %v278_v16, 0.0  ;;  %v346_v10 = vshrl.u32 %v345_v8, 7  ;;  %v341_v16 = vld [vmem:[%s2214_s24] sm:$0x1] }
 0x1d9   :  { %v1797_v20 = vmax.f32 %v270_v13, 0.0  ;;  %v294_v21 = vadd.f32 %v293_v12, %v1794_v11  ;;  %v273_v22 = vadd.f32 %v1271_v59, %v272_v15  ;;  %v337_v12 = vld [vmem:[%s2213_s23] sm:$0x1] }
 0x1da   :  { %v1803_v28 = vmax.f32 %v281_v24, 0.0  ;;  %v1817_v13 = vsub.s32 0, %v346_v10  ;;  %v644_v10 = vld [vmem:[%s2188_s10 + $0x60] sm:$0xff] }
 0x1db   :  { %v295_v23 = vadd.f32 %v294_v21, %v1797_v20  ;;  %v289_v25 = vmax.f32 %v273_v22, 0.0 }
 0x1dd   :  { %v296_v27 = vadd.f32 %v295_v23, %v289_v25 }
 0x1df   :  { %v297_v29 = vadd.f32 %v296_v27, %v1801_v26 }
 0x1e1   :  { %v298_v30 = vadd.f32 %v297_v29, %v1803_v28 }
 0x1e3   :  { %v299_v31 = vrot.slane %v298_v30, 4 }
 0x1e5   :  { %v300_v32 = vadd.f32 %v299_v31, %v298_v30 }
 0x1e7   :  { %v301_v33 = vrot.slane %v300_v32, 2 }
 0x1e9   :  { %v302_v34 = vadd.f32 %v301_v33, %v300_v32 }
 0x1eb   :  { %v303_v35 = vrot.slane %v302_v34, 1 }
 0x1ed   :  { %v304_v36 = vadd.f32 %v303_v35, %v302_v34 }
 0x1ef   :  { %v306_v37 = vmul.f32 0.015625, %v304_v36 }
 0x1f1   :  { %v307_v38 = vsub.f32 %v1786_v3, %v306_v37  ;;  %v308_v39 = vsub.f32 %v1788_v5, %v306_v37  ;;  %v309_v40 = vsub.f32 %v1790_v6, %v306_v37  ;;  %v310_v41 = vsub.f32 %v1794_v11, %v306_v37 }
 0x1f2   :  { %v311_v44 = vsub.f32 %v1797_v20, %v306_v37  ;;  %v312_v47 = vsub.f32 %v289_v25, %v306_v37  ;;  %v313_v50 = vsub.f32 %v1801_v26, %v306_v37  ;;  %v314_v53 = vsub.f32 %v1803_v28, %v306_v37 }
 0x1f3   :  { %v315_v42 = vmul.f32 %v307_v38, %v307_v38  ;;  %v316_v43 = vmul.f32 %v308_v39, %v308_v39  ;;  %v317_v45 = vmul.f32 %v309_v40, %v309_v40  ;;  %v318_v48 = vmul.f32 %v310_v41, %v310_v41 }
 0x1f4   :  { %v319_v51 = vmul.f32 %v311_v44, %v311_v44  ;;  %v320_v54 = vmul.f32 %v312_v47, %v312_v47  ;;  %v321_v56 = vmul.f32 %v313_v50, %v313_v50  ;;  %v322_v58 = vmul.f32 %v314_v53, %v314_v53  ;;  %v633_v53 = vld [vmem:[%s2188_s10 + $0x8] sm:$0xff] }
 0x1f5   :  { %v323_v46 = vadd.f32 %v316_v43, %v315_v42 }
 0x1f7   :  { %v324_v49 = vadd.f32 %v323_v46, %v317_v45 }
 0x1f9   :  { %v325_v52 = vadd.f32 %v324_v49, %v318_v48 }
 0x1fb   :  { %v326_v55 = vadd.f32 %v325_v52, %v319_v51  ;;  %v632_v52 = vld [vmem:[%s2188_s10] sm:$0xff] }
 0x1fd   :  { %v327_v57 = vadd.f32 %v326_v55, %v320_v54  ;;  %v648_v54 = vpack.c.bf16 %v633_v53, %v632_v52  ;;  %v634_v55 = vld [vmem:[%s2188_s10 + $0x10] sm:$0xff] }
 0x1ff   :  { %v328_v59 = vadd.f32 %v327_v57, %v321_v56  ;;  %v635_v56 = vld [vmem:[%s2188_s10 + $0x18] sm:$0xff] }
 0x200   :  { %v649_v57 = vpack.c.bf16 %v635_v56, %v634_v55 }
 0x201   :  { %v329_v60 = vadd.f32 %v328_v59, %v322_v58  ;;  %v636_v58 = vld [vmem:[%s2188_s10 + $0x20] sm:$0xff]  ;;  %v637_v59 = vld [vmem:[%s2188_s10 + $0x28] sm:$0xff] }
 0x203   :  { %v330_v61 = vrot.slane %v329_v60, 4 }
 0x205   :  { %v331_v62 = vadd.f32 %v330_v61, %v329_v60  ;;  %v650_v60 = vpack.c.bf16 %v637_v59, %v636_v58  ;;  %v638_v61 = vld [vmem:[%s2188_s10 + $0x30] sm:$0xff] }
 0x207   :  { %v332_v63 = vrot.slane %v331_v62, 2 }
 0x209   :  { %v333_v0 = vadd.f32 %v332_v63, %v331_v62  ;;  %v639_v62 = vld [vmem:[%s2188_s10 + $0x38] sm:$0xff] }
 0x20a   :  { %v651_v63 = vpack.c.bf16 %v639_v62, %v638_v61 }
 0x20b   :  { %v334_v1 = vrot.slane %v333_v0, 1 }
 0x20d   :  { %v335_v2 = vadd.f32 %v334_v1, %v333_v0  ;;  %v640_v0 = vld [vmem:[%s2188_s10 + $0x40] sm:$0xff]  ;;  %v641_v1 = vld [vmem:[%s2188_s10 + $0x48] sm:$0xff] }
 0x20f   :  { %v336_v4 = vmul.f32 0.015625, %v335_v2  ;;  %v652_v2 = vpack.c.bf16 %v641_v1, %v640_v0 }
 0x211   :  { %v338_v7 = vadd.f32 1e-05, %v336_v4  ;;  %v642_v4 = vld [vmem:[%s2188_s10 + $0x50] sm:$0xff] }
 0x213   :  { %1514 = vrsqrt.f32 %v338_v7  ;;  %v643_v7 = vld [vmem:[%s2188_s10 + $0x58] sm:$0xff] }
 0x214   :  { %v653_v8 = vpack.c.bf16 %v643_v7, %v642_v4 }
 0x21d   :  { %v1515_v14 = vpop.eup %1514 }
 0x21e   :  { %v340_v15 = vmul.f32 %v1515_v14, %v337_v12  ;;  %v645_v12 = vld [vmem:[%s2188_s10 + $0x68] sm:$0xff] }
 0x21f   :  { %v654_v14 = vpack.c.bf16 %v645_v12, %v644_v10 }
 0x220   :  { %v342_v21 = vmul.f32 %v340_v15, %v306_v37  ;;  %v348_v22 = vrot.slane %v340_v15, %v1817_v13  ;;  %v646_v15 = vld [vmem:[%s2188_s10 + $0x70] sm:$0xff] }
 0x222   :  { %v343_v23 = vsub.f32 %v341_v16, %v342_v21  ;;  %v350_v24 = vmul.f32 %v348_v22, %v1786_v3  ;;  %v351_v29 = vmul.f32 %v348_v22, %v1788_v5  ;;  %v352_v30 = vmul.f32 %v348_v22, %v1790_v6  ;;  %v647_v16 = vld [vmem:[%s2188_s10 + $0x78] sm:$0xff] }
 0x223   :  { %v353_v31 = vmul.f32 %v348_v22, %v1794_v11  ;;  %v355_v32 = vmul.f32 %v348_v22, %v289_v25  ;;  %v354_v33 = vmul.f32 %v348_v22, %v1797_v20  ;;  %v356_v5 = vmul.f32 %v348_v22, %v1801_v26 }
 0x224   :  { %v362_v27 = vrot.slane %v343_v23, %v1817_v13  ;;  %v357_v6 = vmul.f32 %v348_v22, %v1803_v28  ;;  %v655_v21 = vpack.c.bf16 %v647_v16, %v646_v15  ;;  %v1276_v22 = vld [vmem:[%s2185_s7] ss:$0 sm:$0xff] }
 0x226   :  { %v364_v34 = vadd.f32 %v362_v27, %v350_v24  ;;  %v365_v35 = vadd.f32 %v362_v27, %v351_v29  ;;  %v366_v36 = vadd.f32 %v362_v27, %v352_v30  ;;  %v367_v37 = vadd.f32 %v362_v27, %v353_v31 }
 0x227   :  { %v368_v38 = vadd.f32 %v362_v27, %v354_v33  ;;  %v369_v39 = vadd.f32 %v362_v27, %v355_v32  ;;  %v370_v11 = vadd.f32 %v362_v27, %v356_v5  ;;  %v371_v25 = vadd.f32 %v362_v27, %v357_v6 }
 0x228   :  { %v372_v40 = vpack.c.bf16 %v365_v35, %v364_v34  ;;  %v373_v41 = vpack.c.bf16 %v367_v37, %v366_v36 }
 0x229   :  { %v374_v3 = vpack.c.bf16 %v369_v39, %v368_v38  ;;  %v375_v42 = vpack.c.bf16 %v371_v25, %v370_v11 }
 0x22a   :  { %1411 = vmatprep.mubr.bf16.mxu1 %v372_v40 }
 0x22b   :  { %1412 = vmatmul.mubr.bf16.vlgmr.msra.gmra.mrb[8].mxu1 %v373_v41 }
 0x22c   :  { %1415 = vmatprep.mubr.bf16.mxu1 %v374_v3 }
 0x233   :  { %1416 = vmatmul.mubr.bf16.gmra.mrb[12].mxu1 %v375_v42 }
 0x234   :  { %1467 = vmatprep.mubr.msk.bf16.mxu1 %vm117_vm0, %v1686_v9 }
 0x2fe   :  { %v1413_v20 = vpop.f32.mrb[8].mxu1 }
 0x2ff   :  { %v434_v43 = vpop.f32.mrb[9].mxu1 }
 0x300   :  { %v1414_v44 = vpop.f32.mrb[10].mxu1 }
 0x301   :  { %v466_v45 = vpack.c.bf16 %v1414_v44, %v1413_v20  ;;  %v437_v46 = vpop.f32.mrb[11].mxu1 }
 0x302   :  { %v465_v47 = vpack.c.bf16 %v437_v46, %v434_v43 }
 0x304   :  { %1419 = vmatprep.subr.bf16.mxu0 %v465_v47 }
 0x305   :  { %1420 = vmatpush3.bf16.msra.mxu0 %v465_v47 }
 0x306   :  { %v1417_v48 = vpop.f32.mrb[12].mxu1  ;;  %1421 = vmatprep.subr.bf16.mxu0 %v466_v45 }
 0x307   :  { %v450_v26 = vpop.f32.mrb[13].mxu1 }
 0x308   :  { %v1418_v28 = vpop.f32.mrb[14].mxu1 }
 0x309   :  { %v468_v49 = vpack.c.bf16 %v1418_v28, %v1417_v48  ;;  %v453_v50 = vpop.f32.mrb[15].mxu1  ;;  %1422 = vmatpush3.bf16.msra.mxu0 %v466_v45 }
 0x30a   :  { %v467_v51 = vpack.c.bf16 %v453_v50, %v450_v26 }
 0x30c   :  { %1423 = vmatprep.subr.bf16.mxu0 %v467_v51 }
 0x30d   :  { %1424 = vmatpush3.bf16.msra.mxu0 %v467_v51 }
 0x30e   :  { %1425 = vmatprep.subr.bf16.mxu0 %v468_v49 }
 0x311   :  { %1426 = vmatpush3.bf16.msra.mxu0 %v468_v49 }
 0x312   :  { %1435 = vmatprep.subr.bf16.mxu0 %v648_v54 }
 0x314   :  { %1428 = vmatmul.mubr.msk.bf16.vlgmr.msra.gmra.mrb[8].mxu0 %vm117_vm0, %v1705_v17 }
 0x315   :  { %1431 = vmatprep.mubr.msk.bf16.mxu0 %vm117_vm0, %v1710_v18  ;;  %1436 = vmatpush3.bf16.msra.mxu0 %v648_v54 }
 0x316   :  { %1437 = vmatprep.subr.bf16.mxu0 %v649_v57 }
 0x319   :  { %1438 = vmatpush3.bf16.msra.mxu0 %v649_v57 }
 0x31a   :  { %1439 = vmatprep.subr.bf16.mxu0 %v650_v60 }
 0x31c   :  { %1432 = vmatmul.mubr.msk.bf16.gmra.mrb[12].mxu0 %vm117_vm0, %v1719_v19 }
 0x31d   :  { %1440 = vmatpush3.bf16.msra.mxu0 %v650_v60 }
 0x31e   :  { %1441 = vmatprep.subr.bf16.mxu0 %v651_v63 }
 0x321   :  { %1442 = vmatpush3.bf16.msra.mxu0 %v651_v63 }
 0x322   :  { %1443 = vmatprep.subr.bf16.mxu0 %v652_v2 }
 0x325   :  { %1444 = vmatpush3.bf16.msra.mxu0 %v652_v2 }
 0x326   :  { %1445 = vmatprep.subr.bf16.mxu0 %v653_v8 }
 0x329   :  { %1446 = vmatpush3.bf16.msra.mxu0 %v653_v8 }
 0x32a   :  { %1447 = vmatprep.subr.bf16.mxu0 %v654_v14 }
 0x32d   :  { %1448 = vmatpush3.bf16.msra.mxu0 %v654_v14 }
 0x32e   :  { %1449 = vmatprep.subr.bf16.mxu0 %v655_v21 }
 0x331   :  { %1450 = vmatpush3.bf16.msra.mxu0 %v655_v21 }
 0x3e7   :  { %v1429_v23 = vpop.f32.mrb[8].mxu0 }
 0x3e8   :  { %v510_v24 = vpop.f32.mrb[9].mxu0  ;;  %v519_v31 = vadd.f32 %v1429_v23, %v1276_v22 }
 0x3e9   :  { %v511_v27 = vadd.f32 %v1276_v22, %v510_v24  ;;  %v1430_v29 = vpop.f32.mrb[10].mxu0 }
 0x3ea   :  { %v513_v30 = vpop.f32.mrb[11].mxu0  ;;  %v522_v34 = vadd.f32 %v1430_v29, %v1276_v22  ;;  %v1894_v36 = vmax.f32 %v519_v31, 0.0 }
 0x3eb   :  { %v514_v32 = vadd.f32 %v1276_v22, %v513_v30  ;;  %v1890_v33 = vmax.f32 %v511_v27, 0.0 }
 0x3ec   :  { %v1898_v40 = vmax.f32 %v522_v34, 0.0 }
 0x3ed   :  { %v1892_v35 = vmax.f32 %v514_v32, 0.0 }
 0x3ef   :  { %v549_v37 = vadd.f32 %v1892_v35, %v1890_v33  ;;  %v1433_v38 = vpop.f32.mrb[12].mxu0 }
 0x3f0   :  { %v526_v39 = vpop.f32.mrb[13].mxu0  ;;  %v535_v11 = vadd.f32 %v1433_v38, %v1276_v22 }
 0x3f1   :  { %v550_v41 = vadd.f32 %v549_v37, %v1894_v36  ;;  %v527_v3 = vadd.f32 %v1276_v22, %v526_v39  ;;  %v1434_v5 = vpop.f32.mrb[14].mxu0  ;;  %v593_v39 = vld [vmem:[%s2186_s8] sm:$0x1] }
 0x3f2   :  { %v529_v6 = vpop.f32.mrb[15].mxu0  ;;  %v538_v44 = vadd.f32 %v1434_v5, %v1276_v22  ;;  %v1905_v46 = vmax.f32 %v535_v11, 0.0  ;;  %v597_v5 = vld [vmem:[%s2187_s9] sm:$0x1] }
 0x3f3   :  { %v1901_v25 = vmax.f32 %v527_v3, 0.0  ;;  %v551_v42 = vadd.f32 %v550_v41, %v1898_v40  ;;  %v530_v20 = vadd.f32 %v1276_v22, %v529_v6 }
 0x3f4   :  { %v1907_v48 = vmax.f32 %v538_v44, 0.0 }
 0x3f5   :  { %v552_v43 = vadd.f32 %v551_v42, %v1901_v25  ;;  %v546_v45 = vmax.f32 %v530_v20, 0.0 }
 0x3f7   :  { %v553_v47 = vadd.f32 %v552_v43, %v546_v45 }
 0x3f9   :  { %v554_v26 = vadd.f32 %v553_v47, %v1905_v46 }
 0x3fb   :  { %v555_v28 = vadd.f32 %v554_v26, %v1907_v48 }
 0x3fd   :  { %v556_v49 = vrot.slane %v555_v28, 4 }
 0x3ff   :  { %v557_v50 = vadd.f32 %v556_v49, %v555_v28 }
 0x401   :  { %v558_v51 = vrot.slane %v557_v50, 2 }
 0x403   :  { %v559_v52 = vadd.f32 %v558_v51, %v557_v50 }
 0x405   :  { %v560_v53 = vrot.slane %v559_v52, 1 }
 0x407   :  { %v561_v54 = vadd.f32 %v560_v53, %v559_v52 }
 0x409   :  { %v562_v55 = vmul.f32 0.015625, %v561_v54 }
 0x40b   :  { %v563_v56 = vsub.f32 %v1890_v33, %v562_v55  ;;  %v564_v57 = vsub.f32 %v1892_v35, %v562_v55  ;;  %v565_v58 = vsub.f32 %v1894_v36, %v562_v55  ;;  %v566_v59 = vsub.f32 %v1898_v40, %v562_v55 }
 0x40c   :  { %v567_v62 = vsub.f32 %v1901_v25, %v562_v55  ;;  %v568_v1 = vsub.f32 %v546_v45, %v562_v55  ;;  %v569_v7 = vsub.f32 %v1905_v46, %v562_v55  ;;  %v570_v12 = vsub.f32 %v1907_v48, %v562_v55 }
 0x40d   :  { %v571_v60 = vmul.f32 %v563_v56, %v563_v56  ;;  %v572_v61 = vmul.f32 %v564_v57, %v564_v57  ;;  %v573_v63 = vmul.f32 %v565_v58, %v565_v58  ;;  %v574_v2 = vmul.f32 %v566_v59, %v566_v59 }
 0x40e   :  { %v575_v8 = vmul.f32 %v567_v62, %v567_v62  ;;  %v576_v14 = vmul.f32 %v568_v1, %v568_v1  ;;  %v577_v16 = vmul.f32 %v569_v7, %v569_v7  ;;  %v578_v22 = vmul.f32 %v570_v12, %v570_v12  ;;  %v905_v7 = vld [vmem:[%s2192_s14 + $0x8] sm:$0xff] }
 0x40f   :  { %v579_v0 = vadd.f32 %v572_v61, %v571_v60  ;;  %v909_v12 = vld [vmem:[%s2192_s14 + $0x28] sm:$0xff] }
 0x411   :  { %v580_v4 = vadd.f32 %v579_v0, %v573_v63 }
 0x413   :  { %v581_v10 = vadd.f32 %v580_v4, %v574_v2 }
 0x415   :  { %v582_v15 = vadd.f32 %v581_v10, %v575_v8  ;;  %v908_v10 = vld [vmem:[%s2192_s14 + $0x20] sm:$0xff] }
 0x417   :  { %v583_v21 = vadd.f32 %v582_v15, %v576_v14  ;;  %v914_v14 = vpack.c.bf16 %v909_v12, %v908_v10  ;;  %v910_v15 = vld [vmem:[%s2192_s14 + $0x30] sm:$0xff] }
 0x419   :  { %v584_v23 = vadd.f32 %v583_v21, %v577_v16  ;;  %v911_v16 = vld [vmem:[%s2192_s14 + $0x38] sm:$0xff] }
 0x41a   :  { %v915_v21 = vpack.c.bf16 %v911_v16, %v910_v15 }
 0x41b   :  { %v585_v24 = vadd.f32 %v584_v23, %v578_v22  ;;  %v1281_v22 = vld [vmem:[%s2189_s11] ss:$0 sm:$0xff] }
 0x41d   :  { %v586_v27 = vrot.slane %v585_v24, 4 }
 0x41f   :  { %v587_v29 = vadd.f32 %v586_v27, %v585_v24 }
 0x421   :  { %v588_v30 = vrot.slane %v587_v29, 2 }
 0x423   :  { %v589_v31 = vadd.f32 %v588_v30, %v587_v29 }
 0x425   :  { %v590_v32 = vrot.slane %v589_v31, 1 }
 0x427   :  { %v591_v34 = vadd.f32 %v590_v32, %v589_v31 }
 0x429   :  { %v592_v37 = vmul.f32 0.015625, %v591_v34 }
 0x42b   :  { %v594_v38 = vadd.f32 1e-05, %v592_v37 }
 0x42d   :  { %1516 = vrsqrt.f32 %v594_v38 }
 0x437   :  { %v1517_v41 = vpop.eup %1516 }
 0x438   :  { %v596_v3 = vmul.f32 %v1517_v41, %v593_v39 }
 0x43a   :  { %v598_v6 = vmul.f32 %v596_v3, %v562_v55  ;;  %v604_v11 = vrot.slane %v596_v3, %v1817_v13 }
 0x43c   :  { %v599_v42 = vsub.f32 %v597_v5, %v598_v6  ;;  %v606_v20 = vmul.f32 %v604_v11, %v1890_v33  ;;  %v607_v44 = vmul.f32 %v604_v11, %v1892_v35  ;;  %v608_v47 = vmul.f32 %v604_v11, %v1894_v36 }
 0x43d   :  { %v609_v26 = vmul.f32 %v604_v11, %v1898_v40  ;;  %v611_v28 = vmul.f32 %v604_v11, %v546_v45  ;;  %v610_v49 = vmul.f32 %v604_v11, %v1901_v25  ;;  %v612_v35 = vmul.f32 %v604_v11, %v1905_v46 }
 0x43e   :  { %v618_v43 = vrot.slane %v599_v42, %v1817_v13  ;;  %v613_v36 = vmul.f32 %v604_v11, %v1907_v48 }
 0x440   :  { %v620_v50 = vadd.f32 %v618_v43, %v606_v20  ;;  %v621_v51 = vadd.f32 %v618_v43, %v607_v44  ;;  %v622_v52 = vadd.f32 %v618_v43, %v608_v47  ;;  %v623_v53 = vadd.f32 %v618_v43, %v609_v26 }
 0x441   :  { %v624_v54 = vadd.f32 %v618_v43, %v610_v49  ;;  %v625_v55 = vadd.f32 %v618_v43, %v611_v28  ;;  %v626_v40 = vadd.f32 %v618_v43, %v612_v35  ;;  %v627_v45 = vadd.f32 %v618_v43, %v613_v36 }
 0x442   :  { %v628_v56 = vpack.c.bf16 %v621_v51, %v620_v50  ;;  %v629_v57 = vpack.c.bf16 %v623_v53, %v622_v52 }
 0x443   :  { %v630_v33 = vpack.c.bf16 %v625_v55, %v624_v54  ;;  %v631_v58 = vpack.c.bf16 %v627_v45, %v626_v40 }
 0x444   :  { %1451 = vmatprep.mubr.bf16.mxu0 %v628_v56 }
 0x445   :  { %1452 = vmatmul.mubr.bf16.vlgmr.msra.gmra.mrb[16].mxu0 %v629_v57 }
 0x446   :  { %1455 = vmatprep.mubr.bf16.mxu0 %v630_v33 }
 0x44d   :  { %1456 = vmatmul.mubr.bf16.gmra.mrb[20].mxu0 %v631_v58 }
 0x44e   :  { %1499 = vmatprep.mubr.msk.bf16.mxu0 %vm117_vm0, %v1686_v9  ;;  %v904_v9 = vld [vmem:[%s2192_s14] sm:$0xff] }
 0x44f   :  { %v912_v8 = vpack.c.bf16 %v905_v7, %v904_v9 }
 0x518   :  { %v1453_v25 = vpop.f32.mrb[16].mxu0 }
 0x519   :  { %v690_v59 = vpop.f32.mrb[17].mxu0 }
 0x51a   :  { %v1454_v60 = vpop.f32.mrb[18].mxu0 }
 0x51b   :  { %v722_v61 = vpack.c.bf16 %v1454_v60, %v1453_v25  ;;  %v693_v62 = vpop.f32.mrb[19].mxu0 }
 0x51c   :  { %v721_v63 = vpack.c.bf16 %v693_v62, %v690_v59 }
 0x51e   :  { %1459 = vmatprep.subr.bf16.mxu1 %v721_v63 }
 0x51f   :  { %1460 = vmatpush3.bf16.msra.mxu1 %v721_v63 }
 0x520   :  { %v1457_v0 = vpop.f32.mrb[20].mxu0  ;;  %1461 = vmatprep.subr.bf16.mxu1 %v722_v61 }
 0x521   :  { %v706_v46 = vpop.f32.mrb[21].mxu0 }
 0x522   :  { %v1458_v48 = vpop.f32.mrb[22].mxu0 }
 0x523   :  { %v724_v1 = vpack.c.bf16 %v1458_v48, %v1457_v0  ;;  %v709_v2 = vpop.f32.mrb[23].mxu0  ;;  %1462 = vmatpush3.bf16.msra.mxu1 %v722_v61 }
 0x524   :  { %v723_v4 = vpack.c.bf16 %v709_v2, %v706_v46 }
 0x526   :  { %1463 = vmatprep.subr.bf16.mxu1 %v723_v4 }
 0x527   :  { %1464 = vmatpush3.bf16.msra.mxu1 %v723_v4 }
 0x528   :  { %1465 = vmatprep.subr.bf16.mxu1 %v724_v1 }
 0x52b   :  { %1466 = vmatpush3.bf16.msra.mxu1 %v724_v1 }
 0x52c   :  { %1475 = vmatprep.subr.bf16.mxu1 %v912_v8 }
 0x52e   :  { %1468 = vmatmul.mubr.msk.bf16.vlgmr.msra.gmra.mrb[16].mxu1 %vm117_vm0, %v1705_v17  ;;  %v906_v17 = vld [vmem:[%s2192_s14 + $0x10] sm:$0xff] }
 0x52f   :  { %1471 = vmatprep.mubr.msk.bf16.mxu1 %vm117_vm0, %v1710_v18  ;;  %1476 = vmatpush3.bf16.msra.mxu1 %v912_v8  ;;  %v907_v18 = vld [vmem:[%s2192_s14 + $0x18] sm:$0xff] }
 0x536   :  { %1472 = vmatmul.mubr.msk.bf16.gmra.mrb[20].mxu1 %vm117_vm0, %v1719_v19  ;;  %v913_v19 = vpack.c.bf16 %v907_v18, %v906_v17 }
 0x538   :  { %1477 = vmatprep.subr.bf16.mxu1 %v913_v19 }
 0x539   :  { %1478 = vmatpush3.bf16.msra.mxu1 %v913_v19 }
 0x53a   :  { %1479 = vmatprep.subr.bf16.mxu1 %v914_v14 }
 0x53d   :  { %1480 = vmatpush3.bf16.msra.mxu1 %v914_v14 }
 0x53e   :  { %1481 = vmatprep.subr.bf16.mxu1 %v915_v21 }
 0x541   :  { %1482 = vmatpush3.bf16.msra.mxu1 %v915_v21 }
 0x601   :  { %v1469_v23 = vpop.f32.mrb[16].mxu1 }
 0x602   :  { %v766_v24 = vpop.f32.mrb[17].mxu1  ;;  %v775_v27 = vadd.f32 %v1469_v23, %v1281_v22 }
 0x603   :  { %v767_v29 = vadd.f32 %v1281_v22, %v766_v24  ;;  %v1470_v30 = vpop.f32.mrb[18].mxu1 }
 0x604   :  { %v769_v31 = vpop.f32.mrb[19].mxu1  ;;  %v778_v34 = vadd.f32 %v1470_v30, %v1281_v22  ;;  %v1970_v38 = vmax.f32 %v775_v27, 0.0 }
 0x605   :  { %v1968_v32 = vmax.f32 %v767_v29, 0.0  ;;  %v770_v37 = vadd.f32 %v1281_v22, %v769_v31 }
 0x606   :  { %v1976_v3 = vmax.f32 %v778_v34, 0.0  ;;  %v808_v20 = vsel %vm117_vm0, %v1970_v38, 0.0 }
 0x607   :  { %v1972_v39 = vmax.f32 %v770_v37, 0.0  ;;  %v805_v41 = vsel %vm117_vm0, %v1968_v32, 0.0 }
 0x608   :  { %v810_v49 = vsel %vm117_vm0, %v1976_v3, 0.0 }
 0x609   :  { %v806_v5 = vsel %vm117_vm0, %v1972_v39, 0.0  ;;  %v1473_v6 = vpop.f32.mrb[20].mxu1 }
 0x60a   :  { %v807_v11 = vadd.f32 %v806_v5, %v805_v41  ;;  %v782_v42 = vpop.f32.mrb[21].mxu1  ;;  %v791_v43 = vadd.f32 %v1473_v6, %v1281_v22 }
 0x60b   :  { %v783_v44 = vadd.f32 %v1281_v22, %v782_v42  ;;  %v1474_v47 = vpop.f32.mrb[22].mxu1 }
 0x60c   :  { %v809_v26 = vadd.f32 %v808_v20, %v807_v11  ;;  %v785_v28 = vpop.f32.mrb[23].mxu1  ;;  %v794_v51 = vadd.f32 %v1474_v47, %v1281_v22  ;;  %v1986_v54 = vmax.f32 %v791_v43, 0.0 }
 0x60d   :  { %v1984_v50 = vmax.f32 %v783_v44, 0.0  ;;  %v786_v52 = vadd.f32 %v1281_v22, %v785_v28 }
 0x60e   :  { %v811_v53 = vadd.f32 %v810_v49, %v809_v26  ;;  %v1992_v33 = vmax.f32 %v794_v51, 0.0  ;;  %v816_v40 = vsel %vm117_vm0, %v1986_v54, 0.0 }
 0x60f   :  { %v812_v55 = vsel %vm117_vm0, %v1984_v50, 0.0  ;;  %v1990_v56 = vmax.f32 %v786_v52, 0.0 }
 0x610   :  { %v813_v57 = vadd.f32 %v812_v55, %v811_v53  ;;  %v818_v58 = vsel %vm117_vm0, %v1992_v33, 0.0  ;;  %v865_v53 = vld [vmem:[%s2190_s12] sm:$0x1] }
 0x611   :  { %v814_v35 = vsel %vm117_vm0, %v1990_v56, 0.0 }
 0x612   :  { %v815_v36 = vadd.f32 %v814_v35, %v813_v57  ;;  %v869_v35 = vld [vmem:[%s2191_s13] sm:$0x1] }
 0x614   :  { %v817_v45 = vadd.f32 %v816_v40, %v815_v36 }
 0x616   :  { %v819_v25 = vadd.f32 %v818_v58, %v817_v45 }
 0x618   :  { %v820_v59 = vrot.slane %v819_v25, 4 }
 0x61a   :  { %v821_v60 = vadd.f32 %v820_v59, %v819_v25 }
 0x61c   :  { %v822_v61 = vrot.slane %v821_v60, 2 }
 0x61e   :  { %v823_v62 = vadd.f32 %v822_v61, %v821_v60 }
 0x620   :  { %v824_v63 = vrot.slane %v823_v62, 1 }
 0x622   :  { %v825_v0 = vadd.f32 %v824_v63, %v823_v62 }
 0x624   :  { %v826_v46 = vmul.f32 0.015625, %v825_v0 }
 0x626   :  { %v827_v48 = vsub.f32 %v1968_v32, %v826_v46  ;;  %v828_v1 = vsub.f32 %v1972_v39, %v826_v46  ;;  %v829_v2 = vsub.f32 %v1970_v38, %v826_v46  ;;  %v830_v4 = vsub.f32 %v1976_v3, %v826_v46 }
 0x627   :  { %v831_v9 = vsub.f32 %v1984_v50, %v826_v46  ;;  %v832_v18 = vsub.f32 %v1990_v56, %v826_v46  ;;  %v833_v15 = vsub.f32 %v1986_v54, %v826_v46  ;;  %v834_v23 = vsub.f32 %v1992_v33, %v826_v46 }
 0x628   :  { %v835_v7 = vmul.f32 %v827_v48, %v827_v48  ;;  %v836_v8 = vmul.f32 %v828_v1, %v828_v1  ;;  %v837_v17 = vmul.f32 %v829_v2, %v829_v2  ;;  %v838_v19 = vmul.f32 %v830_v4, %v830_v4 }
 0x629   :  { %v839_v16 = vmul.f32 %v831_v9, %v831_v9  ;;  %v840_v24 = vmul.f32 %v832_v18, %v832_v18  ;;  %v841_v30 = vmul.f32 %v833_v15, %v833_v15  ;;  %v842_v37 = vmul.f32 %v834_v23, %v834_v23  ;;  %v1523_v23 = vld [vmem:[%s2210_s25 + $0x10] sm:$0xff]  }
 0x62a   :  { %v843_v10 = vsel %vm117_vm0, %v835_v7, 0.0  ;;  %v844_v12 = vsel %vm117_vm0, %v836_v8, 0.0  ;;  %v846_v21 = vsel %vm117_vm0, %v837_v17, 0.0  ;;  %v848_v27 = vsel %vm117_vm0, %v838_v19, 0.0 }
 0x62b   :  { %v845_v14 = vadd.f32 %v844_v12, %v843_v10  ;;  %v850_v31 = vsel %vm117_vm0, %v839_v16, 0.0  ;;  %v852_v41 = vsel %vm117_vm0, %v840_v24, 0.0  ;;  %v854_v6 = vsel %vm117_vm0, %v841_v30, 0.0  ;;  %v1524_v24 = vld [vmem:[%s2210_s25 + $0x18] sm:$0xff]  }
 0x62c   :  { %v856_v42 = vsel %vm117_vm0, %v842_v37, 0.0 }
 0x62d   :  { %v847_v22 = vadd.f32 %v846_v21, %v845_v14 }
 0x62f   :  { %v849_v29 = vadd.f32 %v848_v27, %v847_v22  ;;  %v1522_v22 = vld [vmem:[%s2210_s25 + $0x8] sm:$0xff]   ;;  %v1290_v27 = vld [vmem:[%s2193_s15] ss:$0 sm:$0xff] }
 0x631   :  { %v851_v34 = vadd.f32 %v850_v31, %v849_v29 }
 0x633   :  { %v853_v5 = vadd.f32 %v852_v41, %v851_v34 }
 0x635   :  { %v855_v11 = vadd.f32 %v854_v6, %v853_v5 }
 0x637   :  { %v857_v20 = vadd.f32 %v856_v42, %v855_v11 }
 0x639   :  { %v858_v43 = vrot.slane %v857_v20, 4 }
 0x63b   :  { %v859_v44 = vadd.f32 %v858_v43, %v857_v20 }
 0x63d   :  { %v860_v47 = vrot.slane %v859_v44, 2 }
 0x63f   :  { %v861_v26 = vadd.f32 %v860_v47, %v859_v44 }
 0x641   :  { %v862_v28 = vrot.slane %v861_v26, 1 }
 0x643   :  { %v863_v49 = vadd.f32 %v862_v28, %v861_v26 }
 0x645   :  { %v864_v51 = vmul.f32 0.015625, %v863_v49 }
 0x647   :  { %v866_v52 = vadd.f32 1e-05, %v864_v51 }
 0x649   :  { %1518 = vrsqrt.f32 %v866_v52 }
 0x653   :  { %v1519_v55 = vpop.eup %1518 }
 0x654   :  { %v868_v57 = vmul.f32 %v1519_v55, %v865_v53 }
 0x656   :  { %v870_v36 = vmul.f32 %v868_v57, %v826_v46  ;;  %v876_v40 = vrot.slane %v868_v57, %v1817_v13 }
 0x658   :  { %v871_v45 = vsub.f32 %v869_v35, %v870_v36  ;;  %v883_v58 = vmul.f32 %v876_v40, %v1990_v56  ;;  %v878_v59 = vmul.f32 %v876_v40, %v1968_v32  ;;  %v879_v60 = vmul.f32 %v876_v40, %v1972_v39 }
 0x659   :  { %v880_v61 = vmul.f32 %v876_v40, %v1970_v38  ;;  %v881_v62 = vmul.f32 %v876_v40, %v1976_v3  ;;  %v882_v63 = vmul.f32 %v876_v40, %v1984_v50  ;;  %v884_v32 = vmul.f32 %v876_v40, %v1986_v54 }
 0x65a   :  { %v890_v25 = vrot.slane %v871_v45, %v1817_v13  ;;  %v885_v38 = vmul.f32 %v876_v40, %v1992_v33 }
 0x65c   :  { %v897_v0 = vadd.f32 %v890_v25, %v883_v58  ;;  %v892_v48 = vadd.f32 %v890_v25, %v878_v59  ;;  %v893_v46 = vadd.f32 %v890_v25, %v879_v60  ;;  %v894_v1 = vadd.f32 %v890_v25, %v880_v61 }
 0x65d   :  { %v895_v2 = vadd.f32 %v890_v25, %v881_v62  ;;  %v896_v4 = vadd.f32 %v890_v25, %v882_v63  ;;  %v898_v39 = vadd.f32 %v890_v25, %v884_v32  ;;  %v899_v3 = vadd.f32 %v890_v25, %v885_v38 }
 0x65e   :  { %v900_v9 = vpack.c.bf16 %v893_v46, %v892_v48 }
 0x65f   :  { %v901_v56 = vpack.c.bf16 %v895_v2, %v894_v1  ;;  %v902_v7 = vpack.c.bf16 %v897_v0, %v896_v4  ;;  %v903_v50 = vpack.c.bf16 %v899_v3, %v898_v39 }
 0x660   :  { %1483 = vmatprep.mubr.msk.bf16.mxu1 %vm117_vm0, %v900_v9 }
 0x661   :  { %1484 = vmatmul.mubr.msk.bf16.vlgmr.msra.gmra.mrb[24].mxu1 %vm117_vm0, %v901_v56 }
 0x662   :  { %1487 = vmatprep.mubr.msk.bf16.mxu1 %vm117_vm0, %v902_v7 }
 0x669   :  { %1488 = vmatmul.mubr.msk.bf16.gmra.mrb[28].mxu1 %vm117_vm0, %v903_v50 }
 0x734   :  { %v1485_v8 = vpop.f32.mrb[24].mxu1 }
 0x735   :  { %v962_v17 = vpop.f32.mrb[25].mxu1 }
 0x736   :  { %v1486_v18 = vpop.f32.mrb[26].mxu1 }
 0x737   :  { %v994_v19 = vpack.c.bf16 %v1486_v18, %v1485_v8  ;;  %v965_v10 = vpop.f32.mrb[27].mxu1 }
 0x738   :  { %v993_v12 = vpack.c.bf16 %v965_v10, %v962_v17 }
 0x73a   :  { %1491 = vmatprep.subr.bf16.mxu0 %v993_v12 }
 0x73b   :  { %1492 = vmatpush3.bf16.msra.mxu0 %v993_v12 }
 0x73c   :  { %v1489_v14 = vpop.f32.mrb[28].mxu1  ;;  %1493 = vmatprep.subr.bf16.mxu0 %v994_v19 }
 0x73d   :  { %v978_v54 = vpop.f32.mrb[29].mxu1 }
 0x73e   :  { %v1490_v15 = vpop.f32.mrb[30].mxu1 }
 0x73f   :  { %v996_v33 = vpack.c.bf16 %v1490_v15, %v1489_v14  ;;  %v981_v16 = vpop.f32.mrb[31].mxu1  ;;  %1494 = vmatpush3.bf16.msra.mxu0 %v994_v19 }
 0x740   :  { %v995_v21 = vpack.c.bf16 %v981_v16, %v978_v54 }
 0x742   :  { %1495 = vmatprep.subr.bf16.mxu0 %v995_v21 }
 0x743   :  { %1496 = vmatpush3.bf16.msra.mxu0 %v995_v21 }
 0x744   :  { %1497 = vmatprep.subr.bf16.mxu0 %v996_v33 }
 0x747   :  { %1498 = vmatpush3.bf16.msra.mxu0 %v996_v33 }
 0x74a   :  { %1500 = vmatmul.mubr.msk.bf16.vlgmr.msra.gmra.mrb[24].mxu0 %vm117_vm0, %v1522_v22 }
 0x74b   :  { %1503 = vmatprep.mubr.msk.bf16.mxu0 %vm117_vm0, %v1523_v23 }
 0x752   :  { %1504 = vmatmul.mubr.msk.bf16.gmra.mrb[28].mxu0 %vm117_vm0, %v1524_v24 }
 0x81d   :  { %v1501_v29 = vpop.f32.mrb[24].mxu0 }
 0x81e   :  { %v1038_v30 = vpop.f32.mrb[25].mxu0  ;;  %v1047_v31 = vadd.f32 %v1501_v29, %v1290_v27 }
 0x81f   :  { %v1039_v34 = vadd.f32 %v1290_v27, %v1038_v30  ;;  %v1502_v37 = vpop.f32.mrb[26].mxu0 }
 0x820   :  { %v1041_v41 = vpop.f32.mrb[27].mxu0  ;;  %v1050_v6 = vadd.f32 %v1502_v37, %v1290_v27  ;;  %v2053_v42 = vmax.f32 %v1047_v31, 0.0 }
 0x821   :  { %v2051_v5 = vmax.f32 %v1039_v34, 0.0  ;;  %v1042_v11 = vadd.f32 %v1290_v27, %v1041_v41 }
 0x822   :  { %v2059_v44 = vmax.f32 %v1050_v6, 0.0  ;;  %v1080_v51 = vsel %vm206_vm1, %v2053_v42, 0.0 }
 0x823   :  { %v2055_v20 = vmax.f32 %v1042_v11, 0.0  ;;  %v1077_v43 = vsel %vm206_vm1, %v2051_v5, 0.0 }
 0x824   :  { %v1082_v36 = vsel %vm206_vm1, %v2059_v44, 0.0 }
 0x825   :  { %v1078_v47 = vsel %vm206_vm1, %v2055_v20, 0.0  ;;  %v1505_v26 = vpop.f32.mrb[28].mxu0 }
 0x826   :  { %v1079_v28 = vadd.f32 %v1078_v47, %v1077_v43  ;;  %v1054_v49 = vpop.f32.mrb[29].mxu0  ;;  %v1063_v52 = vadd.f32 %v1505_v26, %v1290_v27 }
 0x827   :  { %v1055_v53 = vadd.f32 %v1290_v27, %v1054_v49  ;;  %v1506_v55 = vpop.f32.mrb[30].mxu0 }
 0x828   :  { %v1081_v57 = vadd.f32 %v1080_v51, %v1079_v28  ;;  %v1057_v35 = vpop.f32.mrb[31].mxu0  ;;  %v1066_v45 = vadd.f32 %v1506_v55, %v1290_v27  ;;  %v2069_v59 = vmax.f32 %v1063_v52, 0.0 }
 0x829   :  { %v2067_v40 = vmax.f32 %v1055_v53, 0.0  ;;  %v1058_v58 = vadd.f32 %v1290_v27, %v1057_v35 }
 0x82a   :  { %v1083_v25 = vadd.f32 %v1082_v36, %v1081_v57  ;;  %v2075_v63 = vmax.f32 %v1066_v45, 0.0  ;;  %v1088_v46 = vsel %vm206_vm1, %v2069_v59, 0.0 }
 0x82b   :  { %v1084_v60 = vsel %vm206_vm1, %v2067_v40, 0.0  ;;  %v2073_v61 = vmax.f32 %v1058_v58, 0.0 }
 0x82c   :  { %v1085_v62 = vadd.f32 %v1084_v60, %v1083_v25  ;;  %v1090_v2 = vsel %vm206_vm1, %v2075_v63, 0.0  ;;  %v1137_v25 = vld [vmem:[%s2194_s16] sm:$0x1] }
 0x82d   :  { %v1086_v0 = vsel %vm206_vm1, %v2073_v61, 0.0 }
 0x82e   :  { %v1087_v48 = vadd.f32 %v1086_v0, %v1085_v62  ;;  %v1141_v0 = vld [vmem:[%s2195_s17] sm:$0x1] }
 0x830   :  { %v1089_v1 = vadd.f32 %v1088_v46, %v1087_v48 }
 0x832   :  { %v1091_v4 = vadd.f32 %v1090_v2, %v1089_v1 }
 0x834   :  { %v1092_v9 = vrot.slane %v1091_v4, 4 }
 0x836   :  { %v1093_v56 = vadd.f32 %v1092_v9, %v1091_v4 }
 0x838   :  { %v1094_v7 = vrot.slane %v1093_v56, 2 }
 0x83a   :  { %v1095_v32 = vadd.f32 %v1094_v7, %v1093_v56 }
 0x83c   :  { %v1096_v38 = vrot.slane %v1095_v32, 1 }
 0x83e   :  { %v1097_v39 = vadd.f32 %v1096_v38, %v1095_v32  ;;  %v1295_v38 = vld [vmem:[%s2196_s18] ss:$0 sm:$0xff] }
 0x840   :  { %v1098_v3 = vmul.f32 0.015625, %v1097_v39 }
 0x842   :  { %v1099_v50 = vsub.f32 %v2051_v5, %v1098_v3  ;;  %v1100_v8 = vsub.f32 %v2055_v20, %v1098_v3  ;;  %v1101_v17 = vsub.f32 %v2053_v42, %v1098_v3  ;;  %v1102_v18 = vsub.f32 %v2059_v44, %v1098_v3 }
 0x843   :  { %v1103_v19 = vsub.f32 %v2067_v40, %v1098_v3  ;;  %v1104_v54 = vsub.f32 %v2073_v61, %v1098_v3  ;;  %v1105_v22 = vsub.f32 %v2069_v59, %v1098_v3  ;;  %v1106_v29 = vsub.f32 %v2075_v63, %v1098_v3 }
 0x844   :  { %v1107_v10 = vmul.f32 %v1099_v50, %v1099_v50  ;;  %v1108_v12 = vmul.f32 %v1100_v8, %v1100_v8  ;;  %v1109_v14 = vmul.f32 %v1101_v17, %v1101_v17  ;;  %v1110_v15 = vmul.f32 %v1102_v18, %v1102_v18 }
 0x845   :  { %v1111_v23 = vmul.f32 %v1103_v19, %v1103_v19  ;;  %v1112_v30 = vmul.f32 %v1104_v54, %v1104_v54  ;;  %v1113_v37 = vmul.f32 %v1105_v22, %v1105_v22  ;;  %v1114_v11 = vmul.f32 %v1106_v29, %v1106_v29 }
 0x846   :  { %v1115_v33 = vsel %vm206_vm1, %v1107_v10, 0.0  ;;  %v1116_v16 = vsel %vm206_vm1, %v1108_v12, 0.0  ;;  %v1118_v24 = vsel %vm206_vm1, %v1109_v14, 0.0  ;;  %v1120_v31 = vsel %vm206_vm1, %v1110_v15, 0.0 }
 0x847   :  { %v1117_v21 = vadd.f32 %v1116_v16, %v1115_v33  ;;  %v1122_v41 = vsel %vm206_vm1, %v1111_v23, 0.0  ;;  %v1124_v43 = vsel %vm206_vm1, %v1112_v30, 0.0  ;;  %v1126_v26 = vsel %vm206_vm1, %v1113_v37, 0.0 }
 0x848   :  { %v1128_v49 = vsel %vm206_vm1, %v1114_v11, 0.0 }
 0x849   :  { %v1119_v27 = vadd.f32 %v1118_v24, %v1117_v21 }
 0x84b   :  { %v1121_v34 = vadd.f32 %v1120_v31, %v1119_v27  ;;  %v1296_v27 = vld [vmem:[#allocation2] ss:$0 sm:$0xff] }
 0x84d   :  { %v1123_v6 = vadd.f32 %v1122_v41, %v1121_v34 }
 0x84f   :  { %v1125_v47 = vadd.f32 %v1124_v43, %v1123_v6 }
 0x851   :  { %v1127_v28 = vadd.f32 %v1126_v26, %v1125_v47 }
 0x853   :  { %v1129_v51 = vadd.f32 %v1128_v49, %v1127_v28 }
 0x855   :  { %v1130_v52 = vrot.slane %v1129_v51, 4 }
 0x857   :  { %v1131_v53 = vadd.f32 %v1130_v52, %v1129_v51 }
 0x859   :  { %v1132_v55 = vrot.slane %v1131_v53, 2 }
 0x85b   :  { %v1133_v57 = vadd.f32 %v1132_v55, %v1131_v53 }
 0x85d   :  { %v1134_v35 = vrot.slane %v1133_v57, 1 }
 0x85f   :  { %v1135_v36 = vadd.f32 %v1134_v35, %v1133_v57 }
 0x861   :  { %v1136_v45 = vmul.f32 0.015625, %v1135_v36 }
 0x863   :  { %v1138_v58 = vadd.f32 1e-05, %v1136_v45 }
 0x865   :  { %1520 = vrsqrt.f32 %v1138_v58 }
 0x86f   :  { %v1521_v60 = vpop.eup %1520 }
 0x870   :  { %v1140_v62 = vmul.f32 %v1521_v60, %v1137_v25 }
 0x872   :  { %v1142_v48 = vmul.f32 %v1140_v62, %v1098_v3  ;;  %v1148_v46 = vrot.slane %v1140_v62, %v1817_v13 }
 0x874   :  { %v1143_v1 = vsub.f32 %v1141_v0, %v1142_v48  ;;  %v1152_v2 = vmul.f32 %v1148_v46, %v2053_v42  ;;  %v1150_v9 = vmul.f32 %v1148_v46, %v2051_v5  ;;  %v1153_v56 = vmul.f32 %v1148_v46, %v2059_v44 }
 0x875   :  { %v1151_v7 = vmul.f32 %v1148_v46, %v2055_v20  ;;  %v1155_v32 = vmul.f32 %v1148_v46, %v2073_v61  ;;  %v1154_v39 = vmul.f32 %v1148_v46, %v2067_v40  ;;  %v1157_v3 = vmul.f32 %v1148_v46, %v2075_v63 }
 0x876   :  { %v1162_v4 = vrot.slane %v1143_v1, %v1817_v13  ;;  %v1156_v42 = vmul.f32 %v1148_v46, %v2069_v59 }
 0x878   :  { %v1166_v50 = vadd.f32 %v1162_v4, %v1152_v2  ;;  %v1164_v13 = vadd.f32 %v1162_v4, %v1150_v9  ;;  %v1167_v8 = vadd.f32 %v1162_v4, %v1153_v56  ;;  %v1165_v5 = vadd.f32 %v1162_v4, %v1151_v7 }
 0x879   :  { %v1169_v17 = vadd.f32 %v1162_v4, %v1155_v32  ;;  %v1168_v44 = vadd.f32 %v1162_v4, %v1154_v39  ;;  %v1171_v18 = vadd.f32 %v1162_v4, %v1157_v3  ;;  %v1170_v20 = vadd.f32 %v1162_v4, %v1156_v42 }
 0x87a   :  { %v1189_v19 = vmul.f32 %v1295_v38, %v1166_v50  ;;  %1174 = vst.msk [vmem:[%s2198_s20 + $0x10] sm:$0xff] %vm206_vm1, %v1166_v50  ;;  %v1187_v61 = vmul.f32 %v1295_v38, %v1164_v13  ;;  %1172 = vst.msk [vmem:[%s2198_s20] sm:$0xff] %vm206_vm1, %v1164_v13  ;;  %v1190_v63 = vmul.f32 %v1295_v38, %v1167_v8 }
 0x87b   :  { %1175 = vst.msk [vmem:[%s2198_s20 + $0x18] sm:$0xff] %vm206_vm1, %v1167_v8  ;;  %1173 = vst.msk [vmem:[%s2198_s20 + $0x8] sm:$0xff] %vm206_vm1, %v1165_v5  ;;  %v1188_v10 = vmul.f32 %v1295_v38, %v1165_v5  ;;  %v1192_v54 = vmul.f32 %v1295_v38, %v1169_v17  ;;  %v1191_v15 = vmul.f32 %v1295_v38, %v1168_v44 }
 0x87c   :  { %1177 = vst.msk [vmem:[%s2198_s20 + $0x28] sm:$0xff] %vm206_vm1, %v1169_v17  ;;  %1176 = vst.msk [vmem:[%s2198_s20 + $0x20] sm:$0xff] %vm206_vm1, %v1168_v44  ;;  %v1201_v40 = vsel %vm206_vm1, %v1189_v19, 0.0  ;;  %v1195_v59 = vsel %vm206_vm1, %v1187_v61, 0.0  ;;  %v1204_v12 = vsel %vm206_vm1, %v1190_v63, 0.0  ;;  %v1194_v21 = vmul.f32 %v1295_v38, %v1171_v18 }
 0x87d   :  { %1179 = vst.msk [vmem:[%s2198_s20 + $0x38] sm:$0xff] %vm206_vm1, %v1171_v18  ;;  %1178 = vst.msk [vmem:[%s2198_s20 + $0x30] sm:$0xff] %vm206_vm1, %v1170_v20  ;;  %1202 = vadd.xlane.f32.xlu1 %v1201_v40  ;;  %1196 = vadd.xlane.f32.xlu0 %v1195_v59  ;;  %v1198_v14 = vsel %vm206_vm1, %v1188_v10, 0.0  ;;  %v1210_v33 = vsel %vm206_vm1, %v1192_v54, 0.0  ;;  %v1207_v16 = vsel %vm206_vm1, %v1191_v15, 0.0  ;;  %v1193_v22 = vmul.f32 %v1295_v38, %v1170_v20  ;;  %s1549_s20 = smov [#allocation3]  }
 0x87e   :  { %v1216_v23 = vsel %vm206_vm1, %v1194_v21, 0.0  ;;  %s1250_s13 = sshll.u32 %s1549_s20, 4  ;;  %s1251_s13 = int_to_ptr.vmem [resolvable:$true] %s1250_s13 }
 0x87f   :  { %v1213_v24 = vsel %vm206_vm1, %v1193_v22, 0.0  ;;  %s1525_s8 = scalar_lea.vmem %s1251_s13, 1024  ;;  %p1530_p1 = scmp.lt.s32.totalorder %s1251_s13, %s1251_s13 }
 0x880   :  { %p1526_p0 = scmp.ne.s32.totalorder %s1251_s13, %s1525_s8  ;;  %p1531_p2 = scmp.lt.s32.totalorder %s1525_s8, %s1525_s8 }
 0x881   :  { %1205 = vadd.xlane.f32.xlu1 %v1204_v12  ;;  %1199 = vadd.xlane.f32.xlu0 %v1198_v14 }
 0x882   :  { %p1532_p3 = por %p1531_p2, %p1530_p1 }
 0x884   :  { %p1533_p4 = pnand %p1532_p3, %p1526_p0 }
 0x885   :  { %1211 = vadd.xlane.f32.xlu1 %v1210_v33  ;;  %1208 = vadd.xlane.f32.xlu0 %v1207_v16 }
 0x889   :  { %1217 = vadd.xlane.f32.xlu1 %v1216_v23  ;;  %1214 = vadd.xlane.f32.xlu0 %v1213_v24 }
 0x90a   :  { %v1203_v29 = vpop.xlane.xlu1 %1202  ;;  %v1197_v30 = vpop.xlane.xlu0 %1196 }
 0x90b   :  { %v1228_v31 = vadd.f32 %v1296_v27, %v1203_v29  ;;  %v1226_v34 = vadd.f32 %v1296_v27, %v1197_v30 }
 0x90d   :  { %1237 = vst.msk [vmem:[#allocation3 + $0x10] sm:$0xff] %vm1234_vm2, %v1228_v31  ;;  %1235 = vst.msk [vmem:[#allocation3] sm:$0xff] %vm1234_vm2, %v1226_v34 }
 0x90e   :  { %v1206_v37 = vpop.xlane.xlu1 %1205  ;;  %v1200_v41 = vpop.xlane.xlu0 %1199 }
 0x90f   :  { %v1229_v6 = vadd.f32 %v1296_v27, %v1206_v37  ;;  %v1227_v11 = vadd.f32 %v1296_v27, %v1200_v41 }
 0x911   :  { %1238 = vst.msk [vmem:[#allocation3 + $0x18] sm:$0xff] %vm1234_vm2, %v1229_v6  ;;  %1236 = vst.msk [vmem:[#allocation3 + $0x8] sm:$0xff] %vm1234_vm2, %v1227_v11 }
 0x912   :  { %v1212_v43 = vpop.xlane.xlu1 %1211  ;;  %v1209_v47 = vpop.xlane.xlu0 %1208 }
 0x913   :  { %v1231_v26 = vadd.f32 %v1296_v27, %v1212_v43  ;;  %v1230_v28 = vadd.f32 %v1296_v27, %v1209_v47 }
 0x915   :  { %1240 = vst.msk [vmem:[#allocation3 + $0x28] sm:$0xff] %vm1234_vm2, %v1231_v26  ;;  %1239 = vst.msk [vmem:[#allocation3 + $0x20] sm:$0xff] %vm1234_vm2, %v1230_v28 }
 0x916   :  { %v1218_v49 = vpop.xlane.xlu1 %1217  ;;  %v1215_v51 = vpop.xlane.xlu0 %1214 }
 0x917   :  { %v1233_v52 = vadd.f32 %v1296_v27, %v1218_v49  ;;  %v1232_v53 = vadd.f32 %v1296_v27, %v1215_v51 }
 0x919   :  { %1242 = vst.msk [vmem:[#allocation3 + $0x38] sm:$0xff] %vm1234_vm2, %v1233_v52  ;;  %1241 = vst.msk [vmem:[#allocation3 + $0x30] sm:$0xff] %vm1234_vm2, %v1232_v53 }
 0x91a   :  { %1536 = shalt.err (!%p1533_p4)
}
 0x91b   :  { %s1537_s0 = scalar_lea.hbm %s2199_s21, 1024 }
 0x91c   :  { %p1538_p5 = scmp.ne.s32.totalorder %s2199_s21, %s1537_s0  ;;  %p1541_p6 = scmp.lt.u32.totalorder %s1537_s0, %s2199_s21 }
 0x91e   :  { %p1543_p7 = pnand %p1541_p6, %p1538_p5 }
 0x920   :  { %1546 = shalt.err (!%p1543_p7)
}
 0x921   :  { %s1550_s5 = smov 128   ;;  %s1551_s19 = smov 8  }
 0x922   :  { %1256 = dma.vmem_to_hbm [thread:$0]  %s1251_s13, 1024, %s2199_s21, [#allocation4], %s1550_s5, %s1550_s5, %s1551_s19  }
 0x923   :  { %1547 = dma.done.wait [#allocation4], 1024  }
 0x924   :  { %1548 = vsyncadd [#allocation4], 4294966272 }
 0x925   :  { %1262 = vsyncpa [#allocation4], 1 }

</bundles_post_ra>
